<compile_context>
chip_gen: v7x
topology: tpu7x:2x2x1
jax: 0.10.0
libtpu: 0.0.40
codegen_flags: <defaults>
</compile_context>

<pallas_src>
import numpy as np
import jax
import jax.numpy as jnp
from jax import lax
from jax.experimental import pallas as pl
from jax.experimental.pallas import tpu as pltpu


# ---------------------------------------------------------------------------
# The single fused Pallas kernel
# ---------------------------------------------------------------------------
def _dann_kernel(p1_ref, w1_ref, b1_ref, w2_ref, b2_ref, msk_ref,
                 wf1_ref, bf1_ref, wf2_ref, bf2_ref,
                 out_ref, f1pad_ref, f2_ref):
    batch = out_ref.shape[0]
    ncol1 = p1_ref.shape[2]          # batch * 196 pooled-conv1 columns
    blk = ncol1 // 4                 # batch * 49  (one pool2-phase block)
    pad = (f1pad_ref.shape[1] - ncol1) // 2

    # ---- conv1 (1->16, 3x3, pad=1) + 2x2 max-pool + ReLU -------------------
    # p1_ref[g] holds the im2col columns for pool-window tap g; pooling is an
    # elementwise max over the 4 matmul results (bias / ReLU commute with max).
    w1 = w1_ref[...]                                            # (16, 9)
    f1 = None
    for g in range(4):
        yg = jnp.dot(w1, p1_ref[g], preferred_element_type=jnp.float32)
        f1 = yg if f1 is None else jnp.maximum(f1, yg)
    f1 = jnp.maximum(f1 + b1_ref[...], 0.0)                     # (16, ncol1)

    # Stash into a zero-padded VMEM scratch so every conv2 tap below is a
    # statically shifted slice (in-VMEM "im2col").
    f1pad_ref[...] = jnp.zeros(f1pad_ref.shape, jnp.float32)
    f1pad_ref[:, pl.ds(pad, ncol1)] = f1

    # ---- conv2 (16->4, 3x3, pad=1) + 2x2 max-pool + ReLU -------------------
    # f1 column order is (alpha, beta, b, P, Q); the conv2 tap at absolute
    # offset (a, e) in {-1..2}^2 is phase block (a%2, e%2) shifted by
    # (7*da + de) columns, masked at the 7x7 block borders.
    taps = {}
    for a in (-1, 0, 1, 2):
        for e in (-1, 0, 1, 2):
            al, be = a % 2, e % 2
            da, de = (a - al) // 2, (e - be) // 2
            start = pad + (al * 2 + be) * blk + 7 * da + de
            mi = (da + 1) * 3 + (de + 1)
            taps[(a, e)] = f1pad_ref[:, pl.ds(start, blk)] * msk_ref[mi]

    f2 = None
    for up in (0, 1):                # pool2 window taps
        for vp in (0, 1):
            acc = jnp.zeros((4, blk), jnp.float32)
            for di in (-1, 0, 1):    # 3x3 conv taps
                for dj in (-1, 0, 1):
                    t = (di + 1) * 3 + (dj + 1)
                    acc = acc + jnp.dot(w2_ref[t], taps[(up + di, vp + dj)],
                                        preferred_element_type=jnp.float32)
            f2 = acc if f2 is None else jnp.maximum(f2, acc)
    f2 = jnp.maximum(f2 + b2_ref[...], 0.0)                     # (4, batch*49)
    f2_ref[...] = f2

    # ---- flatten to PyTorch NCHW order: feature[b, c*49 + p*7 + q] ---------
    rows = []
    for b in range(batch):
        rows.append(jnp.concatenate(
            [f2_ref[pl.ds(c, 1), pl.ds(b * 49, 49)] for c in range(4)],
            axis=1))                                            # (1, 196)
    feature = jnp.concatenate(rows, axis=0)                     # (batch, 196)

    # ---- fused class + domain heads ----------------------------------------
    # TODO(synk): ReverseLayerF only flips gradients; the forward is identity,
    # so both heads consume the same feature here.
    h = jnp.maximum(
        jnp.dot(feature, wf1_ref[...], preferred_element_type=jnp.float32)
        + bf1_ref[...], 0.0)                                    # (batch, 192)
    logits = (jnp.dot(h, wf2_ref[...], preferred_element_type=jnp.float32)
              + bf2_ref[...])                                   # (batch, 12)

    def _log_softmax(z):
        m = jnp.max(z, axis=-1, keepdims=True)
        s = z - m
        return s - jnp.log(jnp.sum(jnp.exp(s), axis=-1, keepdims=True))

    out_ref[...] = jnp.concatenate(
        [_log_softmax(logits[:, 0:10]), _log_softmax(logits[:, 10:12])], axis=1)


# ---------------------------------------------------------------------------
# Wrapper-side glue (tiny, runs once per forward inside the jit)
# ---------------------------------------------------------------------------
def _build_p1g(xpad, batch):
    """Grouped / phase-ordered im2col of the padded input for conv1.

    Returns (4, 9, batch*196): axis0 = 2x2 pool1 tap (u,v); axis1 = 3x3 conv
    tap (kh,kw); axis2 = column ordered (alpha, beta, b, P, Q) where the pooled
    conv1 output pixel is (2P+alpha, 2Q+beta).
    """
    blk = batch * 49
    col = np.arange(4 * blk)
    pb = col // blk
    alpha, beta = pb // 2, pb % 2
    rem = col % blk
    b_of = rem // 49
    s = rem % 49
    pp, qq = s // 7, s % 7
    g = np.arange(4)
    u, v = g // 2, g % 2
    t = np.arange(9)
    kh, kw = t // 3, t % 3
    h_idx = (2 * (2 * pp + alpha))[None, None, :] + u[:, None, None] + kh[None, :, None]
    w_idx = (2 * (2 * qq + beta))[None, None, :] + v[:, None, None] + kw[None, :, None]
    b_idx = np.broadcast_to(b_of[None, None, :], h_idx.shape)
    return xpad[b_idx, h_idx, w_idx]


def _build_mask2(batch):
    """(9, 1, batch*49) border masks for the conv2 shifted-tap reads."""
    blk = batch * 49
    cl = np.arange(blk)
    pp = (cl % 49) // 7
    qq = cl % 7
    m = np.zeros((9, 1, blk), np.float32)
    for da in (-1, 0, 1):
        for de in (-1, 0, 1):
            ok = (pp + da >= 0) & (pp + da < 7) & (qq + de >= 0) & (qq + de < 7)
            m[(da + 1) * 3 + (de + 1), 0] = ok.astype(np.float32)
    return jnp.asarray(m)


def prepare_params(params):
    """One-time re-layout of PyTorch-style weights for the fused kernel."""
    w1t = params["w_conv1"].reshape(16, 9).astype(jnp.float32)
    b1 = params["b_conv1"].reshape(16, 1).astype(jnp.float32)
    w2t = jnp.transpose(params["w_conv2"], (2, 3, 0, 1)).reshape(9, 4, 16)
    b2 = params["b_conv2"].reshape(4, 1).astype(jnp.float32)
    wf1 = jnp.concatenate([params["w_cfc1"].T, params["w_dfc1"].T], axis=1)  # (196,192)
    bf1 = jnp.concatenate([params["b_cfc1"], params["b_dfc1"]]).reshape(1, 192)
    wf2 = jnp.zeros((192, 12), jnp.float32)
    wf2 = wf2.at[0:96, 0:10].set(params["w_cfc2"].T)
    wf2 = wf2.at[96:192, 10:12].set(params["w_dfc2"].T)
    bf2 = jnp.concatenate([params["b_cfc2"], params["b_dfc2"]]).reshape(1, 12)
    return {"w1t": w1t, "b1": b1, "w2t": w2t.astype(jnp.float32), "b2": b2,
            "wf1": wf1, "bf1": bf1, "wf2": wf2, "bf2": bf2}


def dann_forward_prepared(kparams, input_data, alpha):
    del alpha  # gradient reversal is identity in the forward pass
    batch = input_data.shape[0]
    x = input_data.reshape(batch, 28, 28).astype(jnp.float32)
    xpad = jnp.pad(x, ((0, 0), (1, 1), (1, 1)))
    p1g = _build_p1g(xpad, batch)                   # (4, 9, batch*196)
    mask2 = _build_mask2(batch)
    ncol1 = 4 * batch * 49
    pad = 128                                       # lane-aligned scratch border

    flops = 2 * (4 * 16 * 9 * ncol1 + 36 * 4 * 16 * (batch * 49)
                 + batch * 196 * 192 + batch * 192 * 12)
    in_arrays = (p1g, kparams["w1t"], kparams["b1"], kparams["w2t"],
                 kparams["b2"], mask2, kparams["wf1"], kparams["bf1"],
                 kparams["wf2"], kparams["bf2"])
    bytes_accessed = sum(int(np.prod(a.shape)) * 4 for a in in_arrays) + batch * 12 * 4

    out = pl.pallas_call(
        _dann_kernel,
        out_shape=jax.ShapeDtypeStruct((batch, 12), jnp.float32),
        grid=(1,),
        in_specs=[
            pl.BlockSpec(p1g.shape, lambda i: (0, 0, 0)),
            pl.BlockSpec((16, 9), lambda i: (0, 0)),
            pl.BlockSpec((16, 1), lambda i: (0, 0)),
            pl.BlockSpec((9, 4, 16), lambda i: (0, 0, 0)),
            pl.BlockSpec((4, 1), lambda i: (0, 0)),
            pl.BlockSpec(mask2.shape, lambda i: (0, 0, 0)),
            pl.BlockSpec((196, 192), lambda i: (0, 0)),
            pl.BlockSpec((1, 192), lambda i: (0, 0)),
            pl.BlockSpec((192, 12), lambda i: (0, 0)),
            pl.BlockSpec((1, 12), lambda i: (0, 0)),
        ],
        out_specs=pl.BlockSpec((batch, 12), lambda i: (0, 0)),
        scratch_shapes=[
            pltpu.VMEM((16, ncol1 + 2 * pad), jnp.float32),  # zero-padded conv1/pool1 out
            pltpu.VMEM((4, batch * 49), jnp.float32),        # conv2/pool2 out
        ],
        compiler_params=pltpu.CompilerParams(dimension_semantics=("arbitrary",)),
        cost_estimate=pl.CostEstimate(flops=flops, transcendentals=batch * 16,
                                      bytes_accessed=bytes_accessed),
    )(*in_arrays)

    return out[:, 0:10], out[:, 10:12]


def dann_forward(params, input_data, alpha):
    return dann_forward_prepared(prepare_params(params), input_data, alpha)


# ---------------------------------------------------------------------------
# Parameters (deterministic synthetic init; PyTorch layouts)
# ---------------------------------------------------------------------------
def init_params(key):
    ks = jax.random.split(key, 12)

    def nrm(k, shape, scale):
        return (scale * jax.random.normal(k, shape)).astype(jnp.float32)

    return {
        "w_conv1": nrm(ks[0], (16, 1, 3, 3), 0.3),    # Conv2d(1, 16, 3, pad=1)
        "b_conv1": nrm(ks[1], (16,), 0.1),
        "w_conv2": nrm(ks[2], (4, 16, 3, 3), 0.1),    # Conv2d(16, 4, 3, pad=1)
        "b_conv2": nrm(ks[3], (4,), 0.1),
        "w_cfc1": nrm(ks[4], (96, 196), 0.05),        # Linear(4*7*7, 96)
        "b_cfc1": nrm(ks[5], (96,), 0.05),
        "w_cfc2": nrm(ks[6], (10, 96), 0.05),         # Linear(96, 10)
        "b_cfc2": nrm(ks[7], (10,), 0.05),
        "w_dfc1": nrm(ks[8], (96, 196), 0.05),        # Linear(4*7*7, 96)
        "b_dfc1": nrm(ks[9], (96,), 0.05),
        "w_dfc2": nrm(ks[10], (2, 96), 0.05),         # Linear(96, 2)
        "b_dfc2": nrm(ks[11], (2,), 0.05),
    }


# ---------------------------------------------------------------------------
# Pure-JAX reference for correctness checking
# ---------------------------------------------------------------------------
def reference_forward(params, x, alpha):
    del alpha
    batch = x.shape[0]

    def conv(x, w, b):
        y = lax.conv_general_dilated(
            x, w, window_strides=(1, 1), padding=((1, 1), (1, 1)),
            dimension_numbers=("NCHW", "OIHW", "NCHW"))
        return y + b.reshape(1, -1, 1, 1)

    def pool(x):
        return lax.reduce_window(x, -jnp.inf, lax.max,
                                 (1, 1, 2, 2), (1, 1, 2, 2), "VALID")

    f = jnp.maximum(pool(conv(x, params["w_conv1"], params["b_conv1"])), 0.0)
    f = jnp.maximum(pool(conv(f, params["w_conv2"], params["b_conv2"])), 0.0)
    feat = f.reshape(batch, -1)
    h = jnp.maximum(feat @ params["w_cfc1"].T + params["b_cfc1"], 0.0)
    co = jax.nn.log_softmax(h @ params["w_cfc2"].T + params["b_cfc2"], axis=1)
    hd = jnp.maximum(feat @ params["w_dfc1"].T + params["b_dfc1"], 0.0)
    do = jax.nn.log_softmax(hd @ params["w_dfc2"].T + params["b_dfc2"], axis=1)
    return co, do


if __name__ == "__main__":
    key = jax.random.PRNGKey(0)
    k_param, k_in = jax.random.split(key)
    params = init_params(k_param)

    # Module geometry requires 28x28 single-channel input (4*7*7 flatten).
    input_data = jax.random.normal(k_in, (2, 1, 28, 28), dtype=jnp.float32)
    alpha = 0.5

    kparams = prepare_params(params)           # one-time weight re-layout
    fwd = jax.jit(dann_forward_prepared)
    class_out, domain_out = fwd(kparams, input_data, alpha)
    jax.block_until_ready((class_out, domain_out))

    assert class_out.shape == (2, 10) and domain_out.shape == (2, 2)

    ref_class, ref_domain = reference_forward(params, input_data, alpha)
    assert jnp.allclose(class_out, ref_class, rtol=3e-2, atol=3e-2), "class mismatch"
    assert jnp.allclose(domain_out, ref_domain, rtol=3e-2, atol=3e-2), "domain mismatch"

    print("KERNEL_OK")
</pallas_src>

<mosaic_0001>
module attributes {stable_mosaic.version = 11 : i64} {
  func.func @_dann_kernel(%arg0: i32, %arg1: memref<4x9x392xf32, #tpu.memory_space<vmem>>, %arg2: memref<16x9xf32, #tpu.memory_space<vmem>>, %arg3: memref<16x1xf32, #tpu.memory_space<vmem>>, %arg4: memref<9x4x16xf32, #tpu.memory_space<vmem>>, %arg5: memref<4x1xf32, #tpu.memory_space<vmem>>, %arg6: memref<9x1x98xf32, #tpu.memory_space<vmem>>, %arg7: memref<196x192xf32, #tpu.memory_space<vmem>>, %arg8: memref<1x192xf32, #tpu.memory_space<vmem>>, %arg9: memref<192x12xf32, #tpu.memory_space<vmem>>, %arg10: memref<1x12xf32, #tpu.memory_space<vmem>>, %arg11: memref<2x12xf32, #tpu.memory_space<vmem>>, %arg12: memref<16x648xf32, #tpu.memory_space<vmem>>, %arg13: memref<4x98xf32, #tpu.memory_space<vmem>>) attributes {dimension_semantics = [#tpu.dimension_semantics<arbitrary>], iteration_bounds = array<i64: 1>, scalar_prefetch = 0 : i64, scratch_operands = 2 : i64, tpu.core_type = #tpu.core_type<tc>, window_params = [{pipeline_mode = #tpu.pipeline_mode<synchronous>, transform_indices = @transform_0, window_bounds = array<i64: 4, 9, 392>}, {pipeline_mode = #tpu.pipeline_mode<synchronous>, transform_indices = @transform_1, window_bounds = array<i64: 16, 9>}, {pipeline_mode = #tpu.pipeline_mode<synchronous>, transform_indices = @transform_2, window_bounds = array<i64: 16, 1>}, {pipeline_mode = #tpu.pipeline_mode<synchronous>, transform_indices = @transform_3, window_bounds = array<i64: 9, 4, 16>}, {pipeline_mode = #tpu.pipeline_mode<synchronous>, transform_indices = @transform_4, window_bounds = array<i64: 4, 1>}, {pipeline_mode = #tpu.pipeline_mode<synchronous>, transform_indices = @transform_5, window_bounds = array<i64: 9, 1, 98>}, {pipeline_mode = #tpu.pipeline_mode<synchronous>, transform_indices = @transform_6, window_bounds = array<i64: 196, 192>}, {pipeline_mode = #tpu.pipeline_mode<synchronous>, transform_indices = @transform_7, window_bounds = array<i64: 1, 192>}, {pipeline_mode = #tpu.pipeline_mode<synchronous>, transform_indices = @transform_8, window_bounds = array<i64: 192, 12>}, {pipeline_mode = #tpu.pipeline_mode<synchronous>, transform_indices = @transform_9, window_bounds = array<i64: 1, 12>}, {pipeline_mode = #tpu.pipeline_mode<synchronous>, transform_indices = @transform_10, window_bounds = array<i64: 2, 12>}]} {
    %c0 = arith.constant 0 : index
    %c0_0 = arith.constant 0 : index
    %0 = vector.load %arg2[%c0, %c0_0] : memref<16x9xf32, #tpu.memory_space<vmem>>, vector<16x9xf32>
    %c0_1 = arith.constant 0 : index
    %c0_2 = arith.constant 0 : index
    %c0_3 = arith.constant 0 : index
    %1 = vector.load %arg1[%c0_1, %c0_2, %c0_3] : memref<4x9x392xf32, #tpu.memory_space<vmem>>, vector<1x9x392xf32>
    %2 = vector.shape_cast %1 : vector<1x9x392xf32> to vector<9x392xf32>
    %cst = arith.constant dense<0.000000e+00> : vector<16x392xf32>
    %3 = tpu.matmul %0, %2, %cst {dimension_numbers = #tpu.dot_dimension_numbers<[1], [0], [0], [1], [0, 0, 1, 1], [], []>} : vector<16x9xf32>, vector<9x392xf32>, vector<16x392xf32> -> vector<16x392xf32>
    %c1 = arith.constant 1 : index
    %c0_4 = arith.constant 0 : index
    %c0_5 = arith.constant 0 : index
    %4 = vector.load %arg1[%c1, %c0_4, %c0_5] : memref<4x9x392xf32, #tpu.memory_space<vmem>>, vector<1x9x392xf32>
    %5 = vector.shape_cast %4 : vector<1x9x392xf32> to vector<9x392xf32>
    %cst_6 = arith.constant dense<0.000000e+00> : vector<16x392xf32>
    %6 = tpu.matmul %0, %5, %cst_6 {dimension_numbers = #tpu.dot_dimension_numbers<[1], [0], [0], [1], [0, 0, 1, 1], [], []>} : vector<16x9xf32>, vector<9x392xf32>, vector<16x392xf32> -> vector<16x392xf32>
    %7 = arith.maximumf %3, %6 : vector<16x392xf32>
    %c2 = arith.constant 2 : index
    %c0_7 = arith.constant 0 : index
    %c0_8 = arith.constant 0 : index
    %8 = vector.load %arg1[%c2, %c0_7, %c0_8] : memref<4x9x392xf32, #tpu.memory_space<vmem>>, vector<1x9x392xf32>
    %9 = vector.shape_cast %8 : vector<1x9x392xf32> to vector<9x392xf32>
    %cst_9 = arith.constant dense<0.000000e+00> : vector<16x392xf32>
    %10 = tpu.matmul %0, %9, %cst_9 {dimension_numbers = #tpu.dot_dimension_numbers<[1], [0], [0], [1], [0, 0, 1, 1], [], []>} : vector<16x9xf32>, vector<9x392xf32>, vector<16x392xf32> -> vector<16x392xf32>
    %11 = arith.maximumf %7, %10 : vector<16x392xf32>
    %c3 = arith.constant 3 : index
    %c0_10 = arith.constant 0 : index
    %c0_11 = arith.constant 0 : index
    %12 = vector.load %arg1[%c3, %c0_10, %c0_11] : memref<4x9x392xf32, #tpu.memory_space<vmem>>, vector<1x9x392xf32>
    %13 = vector.shape_cast %12 : vector<1x9x392xf32> to vector<9x392xf32>
    %cst_12 = arith.constant dense<0.000000e+00> : vector<16x392xf32>
    %14 = tpu.matmul %0, %13, %cst_12 {dimension_numbers = #tpu.dot_dimension_numbers<[1], [0], [0], [1], [0, 0, 1, 1], [], []>} : vector<16x9xf32>, vector<9x392xf32>, vector<16x392xf32> -> vector<16x392xf32>
    %15 = arith.maximumf %11, %14 : vector<16x392xf32>
    %c0_13 = arith.constant 0 : index
    %c0_14 = arith.constant 0 : index
    %16 = vector.load %arg3[%c0_13, %c0_14] : memref<16x1xf32, #tpu.memory_space<vmem>>, vector<16x1xf32>
    %17 = vector.broadcast %16 : vector<16x1xf32> to vector<16x392xf32>
    %18 = arith.addf %15, %17 : vector<16x392xf32>
    %cst_15 = arith.constant 0.000000e+00 : f32
    %19 = vector.broadcast %cst_15 : f32 to vector<16x392xf32>
    %20 = arith.maximumf %18, %19 : vector<16x392xf32>
    %cst_16 = arith.constant 0.000000e+00 : f32
    %21 = vector.broadcast %cst_16 : f32 to vector<16x648xf32>
    %c0_17 = arith.constant 0 : index
    %c0_18 = arith.constant 0 : index
    %22 = vector.load %arg12[%c0_17, %c0_18] : memref<16x648xf32, #tpu.memory_space<vmem>>, vector<16x648xf32>
    tpu.vector_store %arg12[%c0_17, %c0_18], %21 {strides = array<i32>} : memref<16x648xf32, #tpu.memory_space<vmem>>, vector<16x648xf32>,
    %c0_19 = arith.constant 0 : index
    %c128 = arith.constant 128 : index
    %23 = vector.load %arg12[%c0_19, %c128] : memref<16x648xf32, #tpu.memory_space<vmem>>, vector<16x392xf32>
    tpu.vector_store %arg12[%c0_19, %c128], %20 {strides = array<i32>} : memref<16x648xf32, #tpu.memory_space<vmem>>, vector<16x392xf32>,
    %c0_20 = arith.constant 0 : index
    %c414 = arith.constant 414 : index
    %24 = vector.load %arg12[%c0_20, %c414] : memref<16x648xf32, #tpu.memory_space<vmem>>, vector<16x98xf32>
    %c0_21 = arith.constant 0 : index
    %c0_22 = arith.constant 0 : index
    %c0_23 = arith.constant 0 : index
    %25 = vector.load %arg6[%c0_21, %c0_22, %c0_23] : memref<9x1x98xf32, #tpu.memory_space<vmem>>, vector<1x1x98xf32>
    %26 = vector.shape_cast %25 : vector<1x1x98xf32> to vector<1x98xf32>
    %27 = vector.broadcast %26 : vector<1x98xf32> to vector<16x98xf32>
    %28 = arith.mulf %24, %27 : vector<16x98xf32>
    %c0_24 = arith.constant 0 : index
    %c317 = arith.constant 317 : index
    %29 = vector.load %arg12[%c0_24, %c317] : memref<16x648xf32, #tpu.memory_space<vmem>>, vector<16x98xf32>
    %c1_25 = arith.constant 1 : index
    %c0_26 = arith.constant 0 : index
    %c0_27 = arith.constant 0 : index
    %30 = vector.load %arg6[%c1_25, %c0_26, %c0_27] : memref<9x1x98xf32, #tpu.memory_space<vmem>>, vector<1x1x98xf32>
    %31 = vector.shape_cast %30 : vector<1x1x98xf32> to vector<1x98xf32>
    %32 = vector.broadcast %31 : vector<1x98xf32> to vector<16x98xf32>
    %33 = arith.mulf %29, %32 : vector<16x98xf32>
    %c0_28 = arith.constant 0 : index
    %c415 = arith.constant 415 : index
    %34 = vector.load %arg12[%c0_28, %c415] : memref<16x648xf32, #tpu.memory_space<vmem>>, vector<16x98xf32>
    %c1_29 = arith.constant 1 : index
    %c0_30 = arith.constant 0 : index
    %c0_31 = arith.constant 0 : index
    %35 = vector.load %arg6[%c1_29, %c0_30, %c0_31] : memref<9x1x98xf32, #tpu.memory_space<vmem>>, vector<1x1x98xf32>
    %36 = vector.shape_cast %35 : vector<1x1x98xf32> to vector<1x98xf32>
    %37 = vector.broadcast %36 : vector<1x98xf32> to vector<16x98xf32>
    %38 = arith.mulf %34, %37 : vector<16x98xf32>
    %c0_32 = arith.constant 0 : index
    %c318 = arith.constant 318 : index
    %39 = vector.load %arg12[%c0_32, %c318] : memref<16x648xf32, #tpu.memory_space<vmem>>, vector<16x98xf32>
    %c2_33 = arith.constant 2 : index
    %c0_34 = arith.constant 0 : index
    %c0_35 = arith.constant 0 : index
    %40 = vector.load %arg6[%c2_33, %c0_34, %c0_35] : memref<9x1x98xf32, #tpu.memory_space<vmem>>, vector<1x1x98xf32>
    %41 = vector.shape_cast %40 : vector<1x1x98xf32> to vector<1x98xf32>
    %42 = vector.broadcast %41 : vector<1x98xf32> to vector<16x98xf32>
    %43 = arith.mulf %39, %42 : vector<16x98xf32>
    %c0_36 = arith.constant 0 : index
    %c225 = arith.constant 225 : index
    %44 = vector.load %arg12[%c0_36, %c225] : memref<16x648xf32, #tpu.memory_space<vmem>>, vector<16x98xf32>
    %c3_37 = arith.constant 3 : index
    %c0_38 = arith.constant 0 : index
    %c0_39 = arith.constant 0 : index
    %45 = vector.load %arg6[%c3_37, %c0_38, %c0_39] : memref<9x1x98xf32, #tpu.memory_space<vmem>>, vector<1x1x98xf32>
    %46 = vector.shape_cast %45 : vector<1x1x98xf32> to vector<1x98xf32>
    %47 = vector.broadcast %46 : vector<1x98xf32> to vector<16x98xf32>
    %48 = arith.mulf %44, %47 : vector<16x98xf32>
    %c0_40 = arith.constant 0 : index
    %c128_41 = arith.constant 128 : index
    %49 = vector.load %arg12[%c0_40, %c128_41] : memref<16x648xf32, #tpu.memory_space<vmem>>, vector<16x98xf32>
    %c4 = arith.constant 4 : index
    %c0_42 = arith.constant 0 : index
    %c0_43 = arith.constant 0 : index
    %50 = vector.load %arg6[%c4, %c0_42, %c0_43] : memref<9x1x98xf32, #tpu.memory_space<vmem>>, vector<1x1x98xf32>
    %51 = vector.shape_cast %50 : vector<1x1x98xf32> to vector<1x98xf32>
    %52 = vector.broadcast %51 : vector<1x98xf32> to vector<16x98xf32>
    %53 = arith.mulf %49, %52 : vector<16x98xf32>
    %c0_44 = arith.constant 0 : index
    %c226 = arith.constant 226 : index
    %54 = vector.load %arg12[%c0_44, %c226] : memref<16x648xf32, #tpu.memory_space<vmem>>, vector<16x98xf32>
    %c4_45 = arith.constant 4 : index
    %c0_46 = arith.constant 0 : index
    %c0_47 = arith.constant 0 : index
    %55 = vector.load %arg6[%c4_45, %c0_46, %c0_47] : memref<9x1x98xf32, #tpu.memory_space<vmem>>, vector<1x1x98xf32>
    %56 = vector.shape_cast %55 : vector<1x1x98xf32> to vector<1x98xf32>
    %57 = vector.broadcast %56 : vector<1x98xf32> to vector<16x98xf32>
    %58 = arith.mulf %54, %57 : vector<16x98xf32>
    %c0_48 = arith.constant 0 : index
    %c129 = arith.constant 129 : index
    %59 = vector.load %arg12[%c0_48, %c129] : memref<16x648xf32, #tpu.memory_space<vmem>>, vector<16x98xf32>
    %c5 = arith.constant 5 : index
    %c0_49 = arith.constant 0 : index
    %c0_50 = arith.constant 0 : index
    %60 = vector.load %arg6[%c5, %c0_49, %c0_50] : memref<9x1x98xf32, #tpu.memory_space<vmem>>, vector<1x1x98xf32>
    %61 = vector.shape_cast %60 : vector<1x1x98xf32> to vector<1x98xf32>
    %62 = vector.broadcast %61 : vector<1x98xf32> to vector<16x98xf32>
    %63 = arith.mulf %59, %62 : vector<16x98xf32>
    %c0_51 = arith.constant 0 : index
    %c421 = arith.constant 421 : index
    %64 = vector.load %arg12[%c0_51, %c421] : memref<16x648xf32, #tpu.memory_space<vmem>>, vector<16x98xf32>
    %c3_52 = arith.constant 3 : index
    %c0_53 = arith.constant 0 : index
    %c0_54 = arith.constant 0 : index
    %65 = vector.load %arg6[%c3_52, %c0_53, %c0_54] : memref<9x1x98xf32, #tpu.memory_space<vmem>>, vector<1x1x98xf32>
    %66 = vector.shape_cast %65 : vector<1x1x98xf32> to vector<1x98xf32>
    %67 = vector.broadcast %66 : vector<1x98xf32> to vector<16x98xf32>
    %68 = arith.mulf %64, %67 : vector<16x98xf32>
    %c0_55 = arith.constant 0 : index
    %c324 = arith.constant 324 : index
    %69 = vector.load %arg12[%c0_55, %c324] : memref<16x648xf32, #tpu.memory_space<vmem>>, vector<16x98xf32>
    %c4_56 = arith.constant 4 : index
    %c0_57 = arith.constant 0 : index
    %c0_58 = arith.constant 0 : index
    %70 = vector.load %arg6[%c4_56, %c0_57, %c0_58] : memref<9x1x98xf32, #tpu.memory_space<vmem>>, vector<1x1x98xf32>
    %71 = vector.shape_cast %70 : vector<1x1x98xf32> to vector<1x98xf32>
    %72 = vector.broadcast %71 : vector<1x98xf32> to vector<16x98xf32>
    %73 = arith.mulf %69, %72 : vector<16x98xf32>
    %c0_59 = arith.constant 0 : index
    %c422 = arith.constant 422 : index
    %74 = vector.load %arg12[%c0_59, %c422] : memref<16x648xf32, #tpu.memory_space<vmem>>, vector<16x98xf32>
    %c4_60 = arith.constant 4 : index
    %c0_61 = arith.constant 0 : index
    %c0_62 = arith.constant 0 : index
    %75 = vector.load %arg6[%c4_60, %c0_61, %c0_62] : memref<9x1x98xf32, #tpu.memory_space<vmem>>, vector<1x1x98xf32>
    %76 = vector.shape_cast %75 : vector<1x1x98xf32> to vector<1x98xf32>
    %77 = vector.broadcast %76 : vector<1x98xf32> to vector<16x98xf32>
    %78 = arith.mulf %74, %77 : vector<16x98xf32>
    %c0_63 = arith.constant 0 : index
    %c325 = arith.constant 325 : index
    %79 = vector.load %arg12[%c0_63, %c325] : memref<16x648xf32, #tpu.memory_space<vmem>>, vector<16x98xf32>
    %c5_64 = arith.constant 5 : index
    %c0_65 = arith.constant 0 : index
    %c0_66 = arith.constant 0 : index
    %80 = vector.load %arg6[%c5_64, %c0_65, %c0_66] : memref<9x1x98xf32, #tpu.memory_space<vmem>>, vector<1x1x98xf32>
    %81 = vector.shape_cast %80 : vector<1x1x98xf32> to vector<1x98xf32>
    %82 = vector.broadcast %81 : vector<1x98xf32> to vector<16x98xf32>
    %83 = arith.mulf %79, %82 : vector<16x98xf32>
    %c0_67 = arith.constant 0 : index
    %c232 = arith.constant 232 : index
    %84 = vector.load %arg12[%c0_67, %c232] : memref<16x648xf32, #tpu.memory_space<vmem>>, vector<16x98xf32>
    %c6 = arith.constant 6 : index
    %c0_68 = arith.constant 0 : index
    %c0_69 = arith.constant 0 : index
    %85 = vector.load %arg6[%c6, %c0_68, %c0_69] : memref<9x1x98xf32, #tpu.memory_space<vmem>>, vector<1x1x98xf32>
    %86 = vector.shape_cast %85 : vector<1x1x98xf32> to vector<1x98xf32>
    %87 = vector.broadcast %86 : vector<1x98xf32> to vector<16x98xf32>
    %88 = arith.mulf %84, %87 : vector<16x98xf32>
    %c0_70 = arith.constant 0 : index
    %c135 = arith.constant 135 : index
    %89 = vector.load %arg12[%c0_70, %c135] : memref<16x648xf32, #tpu.memory_space<vmem>>, vector<16x98xf32>
    %c7 = arith.constant 7 : index
    %c0_71 = arith.constant 0 : index
    %c0_72 = arith.constant 0 : index
    %90 = vector.load %arg6[%c7, %c0_71, %c0_72] : memref<9x1x98xf32, #tpu.memory_space<vmem>>, vector<1x1x98xf32>
    %91 = vector.shape_cast %90 : vector<1x1x98xf32> to vector<1x98xf32>
    %92 = vector.broadcast %91 : vector<1x98xf32> to vector<16x98xf32>
    %93 = arith.mulf %89, %92 : vector<16x98xf32>
    %c0_73 = arith.constant 0 : index
    %c233 = arith.constant 233 : index
    %94 = vector.load %arg12[%c0_73, %c233] : memref<16x648xf32, #tpu.memory_space<vmem>>, vector<16x98xf32>
    %c7_74 = arith.constant 7 : index
    %c0_75 = arith.constant 0 : index
    %c0_76 = arith.constant 0 : index
    %95 = vector.load %arg6[%c7_74, %c0_75, %c0_76] : memref<9x1x98xf32, #tpu.memory_space<vmem>>, vector<1x1x98xf32>
    %96 = vector.shape_cast %95 : vector<1x1x98xf32> to vector<1x98xf32>
    %97 = vector.broadcast %96 : vector<1x98xf32> to vector<16x98xf32>
    %98 = arith.mulf %94, %97 : vector<16x98xf32>
    %c0_77 = arith.constant 0 : index
    %c136 = arith.constant 136 : index
    %99 = vector.load %arg12[%c0_77, %c136] : memref<16x648xf32, #tpu.memory_space<vmem>>, vector<16x98xf32>
    %c8 = arith.constant 8 : index
    %c0_78 = arith.constant 0 : index
    %c0_79 = arith.constant 0 : index
    %100 = vector.load %arg6[%c8, %c0_78, %c0_79] : memref<9x1x98xf32, #tpu.memory_space<vmem>>, vector<1x1x98xf32>
    %101 = vector.shape_cast %100 : vector<1x1x98xf32> to vector<1x98xf32>
    %102 = vector.broadcast %101 : vector<1x98xf32> to vector<16x98xf32>
    %103 = arith.mulf %99, %102 : vector<16x98xf32>
    %cst_80 = arith.constant 0.000000e+00 : f32
    %104 = vector.broadcast %cst_80 : f32 to vector<4x98xf32>
    %c0_81 = arith.constant 0 : index
    %c0_82 = arith.constant 0 : index
    %c0_83 = arith.constant 0 : index
    %105 = vector.load %arg4[%c0_81, %c0_82, %c0_83] : memref<9x4x16xf32, #tpu.memory_space<vmem>>, vector<1x4x16xf32>
    %106 = vector.shape_cast %105 : vector<1x4x16xf32> to vector<4x16xf32>
    %cst_84 = arith.constant dense<0.000000e+00> : vector<4x98xf32>
    %107 = tpu.matmul %106, %28, %cst_84 {dimension_numbers = #tpu.dot_dimension_numbers<[1], [0], [0], [1], [0, 0, 1, 1], [], []>} : vector<4x16xf32>, vector<16x98xf32>, vector<4x98xf32> -> vector<4x98xf32>
    %108 = arith.addf %104, %107 : vector<4x98xf32>
    %c1_85 = arith.constant 1 : index
    %c0_86 = arith.constant 0 : index
    %c0_87 = arith.constant 0 : index
    %109 = vector.load %arg4[%c1_85, %c0_86, %c0_87] : memref<9x4x16xf32, #tpu.memory_space<vmem>>, vector<1x4x16xf32>
    %110 = vector.shape_cast %109 : vector<1x4x16xf32> to vector<4x16xf32>
    %cst_88 = arith.constant dense<0.000000e+00> : vector<4x98xf32>
    %111 = tpu.matmul %110, %33, %cst_88 {dimension_numbers = #tpu.dot_dimension_numbers<[1], [0], [0], [1], [0, 0, 1, 1], [], []>} : vector<4x16xf32>, vector<16x98xf32>, vector<4x98xf32> -> vector<4x98xf32>
    %112 = arith.addf %108, %111 : vector<4x98xf32>
    %c2_89 = arith.constant 2 : index
    %c0_90 = arith.constant 0 : index
    %c0_91 = arith.constant 0 : index
    %113 = vector.load %arg4[%c2_89, %c0_90, %c0_91] : memref<9x4x16xf32, #tpu.memory_space<vmem>>, vector<1x4x16xf32>
    %114 = vector.shape_cast %113 : vector<1x4x16xf32> to vector<4x16xf32>
    %cst_92 = arith.constant dense<0.000000e+00> : vector<4x98xf32>
    %115 = tpu.matmul %114, %38, %cst_92 {dimension_numbers = #tpu.dot_dimension_numbers<[1], [0], [0], [1], [0, 0, 1, 1], [], []>} : vector<4x16xf32>, vector<16x98xf32>, vector<4x98xf32> -> vector<4x98xf32>
    %116 = arith.addf %112, %115 : vector<4x98xf32>
    %c3_93 = arith.constant 3 : index
    %c0_94 = arith.constant 0 : index
    %c0_95 = arith.constant 0 : index
    %117 = vector.load %arg4[%c3_93, %c0_94, %c0_95] : memref<9x4x16xf32, #tpu.memory_space<vmem>>, vector<1x4x16xf32>
    %118 = vector.shape_cast %117 : vector<1x4x16xf32> to vector<4x16xf32>
    %cst_96 = arith.constant dense<0.000000e+00> : vector<4x98xf32>
    %119 = tpu.matmul %118, %48, %cst_96 {dimension_numbers = #tpu.dot_dimension_numbers<[1], [0], [0], [1], [0, 0, 1, 1], [], []>} : vector<4x16xf32>, vector<16x98xf32>, vector<4x98xf32> -> vector<4x98xf32>
    %120 = arith.addf %116, %119 : vector<4x98xf32>
    %c4_97 = arith.constant 4 : index
    %c0_98 = arith.constant 0 : index
    %c0_99 = arith.constant 0 : index
    %121 = vector.load %arg4[%c4_97, %c0_98, %c0_99] : memref<9x4x16xf32, #tpu.memory_space<vmem>>, vector<1x4x16xf32>
    %122 = vector.shape_cast %121 : vector<1x4x16xf32> to vector<4x16xf32>
    %cst_100 = arith.constant dense<0.000000e+00> : vector<4x98xf32>
    %123 = tpu.matmul %122, %53, %cst_100 {dimension_numbers = #tpu.dot_dimension_numbers<[1], [0], [0], [1], [0, 0, 1, 1], [], []>} : vector<4x16xf32>, vector<16x98xf32>, vector<4x98xf32> -> vector<4x98xf32>
    %124 = arith.addf %120, %123 : vector<4x98xf32>
    %c5_101 = arith.constant 5 : index
    %c0_102 = arith.constant 0 : index
    %c0_103 = arith.constant 0 : index
    %125 = vector.load %arg4[%c5_101, %c0_102, %c0_103] : memref<9x4x16xf32, #tpu.memory_space<vmem>>, vector<1x4x16xf32>
    %126 = vector.shape_cast %125 : vector<1x4x16xf32> to vector<4x16xf32>
    %cst_104 = arith.constant dense<0.000000e+00> : vector<4x98xf32>
    %127 = tpu.matmul %126, %58, %cst_104 {dimension_numbers = #tpu.dot_dimension_numbers<[1], [0], [0], [1], [0, 0, 1, 1], [], []>} : vector<4x16xf32>, vector<16x98xf32>, vector<4x98xf32> -> vector<4x98xf32>
    %128 = arith.addf %124, %127 : vector<4x98xf32>
    %c6_105 = arith.constant 6 : index
    %c0_106 = arith.constant 0 : index
    %c0_107 = arith.constant 0 : index
    %129 = vector.load %arg4[%c6_105, %c0_106, %c0_107] : memref<9x4x16xf32, #tpu.memory_space<vmem>>, vector<1x4x16xf32>
    %130 = vector.shape_cast %129 : vector<1x4x16xf32> to vector<4x16xf32>
    %cst_108 = arith.constant dense<0.000000e+00> : vector<4x98xf32>
    %131 = tpu.matmul %130, %68, %cst_108 {dimension_numbers = #tpu.dot_dimension_numbers<[1], [0], [0], [1], [0, 0, 1, 1], [], []>} : vector<4x16xf32>, vector<16x98xf32>, vector<4x98xf32> -> vector<4x98xf32>
    %132 = arith.addf %128, %131 : vector<4x98xf32>
    %c7_109 = arith.constant 7 : index
    %c0_110 = arith.constant 0 : index
    %c0_111 = arith.constant 0 : index
    %133 = vector.load %arg4[%c7_109, %c0_110, %c0_111] : memref<9x4x16xf32, #tpu.memory_space<vmem>>, vector<1x4x16xf32>
    %134 = vector.shape_cast %133 : vector<1x4x16xf32> to vector<4x16xf32>
    %cst_112 = arith.constant dense<0.000000e+00> : vector<4x98xf32>
    %135 = tpu.matmul %134, %73, %cst_112 {dimension_numbers = #tpu.dot_dimension_numbers<[1], [0], [0], [1], [0, 0, 1, 1], [], []>} : vector<4x16xf32>, vector<16x98xf32>, vector<4x98xf32> -> vector<4x98xf32>
    %136 = arith.addf %132, %135 : vector<4x98xf32>
    %c8_113 = arith.constant 8 : index
    %c0_114 = arith.constant 0 : index
    %c0_115 = arith.constant 0 : index
    %137 = vector.load %arg4[%c8_113, %c0_114, %c0_115] : memref<9x4x16xf32, #tpu.memory_space<vmem>>, vector<1x4x16xf32>
    %138 = vector.shape_cast %137 : vector<1x4x16xf32> to vector<4x16xf32>
    %cst_116 = arith.constant dense<0.000000e+00> : vector<4x98xf32>
    %139 = tpu.matmul %138, %78, %cst_116 {dimension_numbers = #tpu.dot_dimension_numbers<[1], [0], [0], [1], [0, 0, 1, 1], [], []>} : vector<4x16xf32>, vector<16x98xf32>, vector<4x98xf32> -> vector<4x98xf32>
    %140 = arith.addf %136, %139 : vector<4x98xf32>
    %cst_117 = arith.constant 0.000000e+00 : f32
    %141 = vector.broadcast %cst_117 : f32 to vector<4x98xf32>
    %c0_118 = arith.constant 0 : index
    %c0_119 = arith.constant 0 : index
    %c0_120 = arith.constant 0 : index
    %142 = vector.load %arg4[%c0_118, %c0_119, %c0_120] : memref<9x4x16xf32, #tpu.memory_space<vmem>>, vector<1x4x16xf32>
    %143 = vector.shape_cast %142 : vector<1x4x16xf32> to vector<4x16xf32>
    %cst_121 = arith.constant dense<0.000000e+00> : vector<4x98xf32>
    %144 = tpu.matmul %143, %33, %cst_121 {dimension_numbers = #tpu.dot_dimension_numbers<[1], [0], [0], [1], [0, 0, 1, 1], [], []>} : vector<4x16xf32>, vector<16x98xf32>, vector<4x98xf32> -> vector<4x98xf32>
    %145 = arith.addf %141, %144 : vector<4x98xf32>
    %c1_122 = arith.constant 1 : index
    %c0_123 = arith.constant 0 : index
    %c0_124 = arith.constant 0 : index
    %146 = vector.load %arg4[%c1_122, %c0_123, %c0_124] : memref<9x4x16xf32, #tpu.memory_space<vmem>>, vector<1x4x16xf32>
    %147 = vector.shape_cast %146 : vector<1x4x16xf32> to vector<4x16xf32>
    %cst_125 = arith.constant dense<0.000000e+00> : vector<4x98xf32>
    %148 = tpu.matmul %147, %38, %cst_125 {dimension_numbers = #tpu.dot_dimension_numbers<[1], [0], [0], [1], [0, 0, 1, 1], [], []>} : vector<4x16xf32>, vector<16x98xf32>, vector<4x98xf32> -> vector<4x98xf32>
    %149 = arith.addf %145, %148 : vector<4x98xf32>
    %c2_126 = arith.constant 2 : index
    %c0_127 = arith.constant 0 : index
    %c0_128 = arith.constant 0 : index
    %150 = vector.load %arg4[%c2_126, %c0_127, %c0_128] : memref<9x4x16xf32, #tpu.memory_space<vmem>>, vector<1x4x16xf32>
    %151 = vector.shape_cast %150 : vector<1x4x16xf32> to vector<4x16xf32>
    %cst_129 = arith.constant dense<0.000000e+00> : vector<4x98xf32>
    %152 = tpu.matmul %151, %43, %cst_129 {dimension_numbers = #tpu.dot_dimension_numbers<[1], [0], [0], [1], [0, 0, 1, 1], [], []>} : vector<4x16xf32>, vector<16x98xf32>, vector<4x98xf32> -> vector<4x98xf32>
    %153 = arith.addf %149, %152 : vector<4x98xf32>
    %c3_130 = arith.constant 3 : index
    %c0_131 = arith.constant 0 : index
    %c0_132 = arith.constant 0 : index
    %154 = vector.load %arg4[%c3_130, %c0_131, %c0_132] : memref<9x4x16xf32, #tpu.memory_space<vmem>>, vector<1x4x16xf32>
    %155 = vector.shape_cast %154 : vector<1x4x16xf32> to vector<4x16xf32>
    %cst_133 = arith.constant dense<0.000000e+00> : vector<4x98xf32>
    %156 = tpu.matmul %155, %53, %cst_133 {dimension_numbers = #tpu.dot_dimension_numbers<[1], [0], [0], [1], [0, 0, 1, 1], [], []>} : vector<4x16xf32>, vector<16x98xf32>, vector<4x98xf32> -> vector<4x98xf32>
    %157 = arith.addf %153, %156 : vector<4x98xf32>
    %c4_134 = arith.constant 4 : index
    %c0_135 = arith.constant 0 : index
    %c0_136 = arith.constant 0 : index
    %158 = vector.load %arg4[%c4_134, %c0_135, %c0_136] : memref<9x4x16xf32, #tpu.memory_space<vmem>>, vector<1x4x16xf32>
    %159 = vector.shape_cast %158 : vector<1x4x16xf32> to vector<4x16xf32>
    %cst_137 = arith.constant dense<0.000000e+00> : vector<4x98xf32>
    %160 = tpu.matmul %159, %58, %cst_137 {dimension_numbers = #tpu.dot_dimension_numbers<[1], [0], [0], [1], [0, 0, 1, 1], [], []>} : vector<4x16xf32>, vector<16x98xf32>, vector<4x98xf32> -> vector<4x98xf32>
    %161 = arith.addf %157, %160 : vector<4x98xf32>
    %c5_138 = arith.constant 5 : index
    %c0_139 = arith.constant 0 : index
    %c0_140 = arith.constant 0 : index
    %162 = vector.load %arg4[%c5_138, %c0_139, %c0_140] : memref<9x4x16xf32, #tpu.memory_space<vmem>>, vector<1x4x16xf32>
    %163 = vector.shape_cast %162 : vector<1x4x16xf32> to vector<4x16xf32>
    %cst_141 = arith.constant dense<0.000000e+00> : vector<4x98xf32>
    %164 = tpu.matmul %163, %63, %cst_141 {dimension_numbers = #tpu.dot_dimension_numbers<[1], [0], [0], [1], [0, 0, 1, 1], [], []>} : vector<4x16xf32>, vector<16x98xf32>, vector<4x98xf32> -> vector<4x98xf32>
    %165 = arith.addf %161, %164 : vector<4x98xf32>
    %c6_142 = arith.constant 6 : index
    %c0_143 = arith.constant 0 : index
    %c0_144 = arith.constant 0 : index
    %166 = vector.load %arg4[%c6_142, %c0_143, %c0_144] : memref<9x4x16xf32, #tpu.memory_space<vmem>>, vector<1x4x16xf32>
    %167 = vector.shape_cast %166 : vector<1x4x16xf32> to vector<4x16xf32>
    %cst_145 = arith.constant dense<0.000000e+00> : vector<4x98xf32>
    %168 = tpu.matmul %167, %73, %cst_145 {dimension_numbers = #tpu.dot_dimension_numbers<[1], [0], [0], [1], [0, 0, 1, 1], [], []>} : vector<4x16xf32>, vector<16x98xf32>, vector<4x98xf32> -> vector<4x98xf32>
    %169 = arith.addf %165, %168 : vector<4x98xf32>
    %c7_146 = arith.constant 7 : index
    %c0_147 = arith.constant 0 : index
    %c0_148 = arith.constant 0 : index
    %170 = vector.load %arg4[%c7_146, %c0_147, %c0_148] : memref<9x4x16xf32, #tpu.memory_space<vmem>>, vector<1x4x16xf32>
    %171 = vector.shape_cast %170 : vector<1x4x16xf32> to vector<4x16xf32>
    %cst_149 = arith.constant dense<0.000000e+00> : vector<4x98xf32>
    %172 = tpu.matmul %171, %78, %cst_149 {dimension_numbers = #tpu.dot_dimension_numbers<[1], [0], [0], [1], [0, 0, 1, 1], [], []>} : vector<4x16xf32>, vector<16x98xf32>, vector<4x98xf32> -> vector<4x98xf32>
    %173 = arith.addf %169, %172 : vector<4x98xf32>
    %c8_150 = arith.constant 8 : index
    %c0_151 = arith.constant 0 : index
    %c0_152 = arith.constant 0 : index
    %174 = vector.load %arg4[%c8_150, %c0_151, %c0_152] : memref<9x4x16xf32, #tpu.memory_space<vmem>>, vector<1x4x16xf32>
    %175 = vector.shape_cast %174 : vector<1x4x16xf32> to vector<4x16xf32>
    %cst_153 = arith.constant dense<0.000000e+00> : vector<4x98xf32>
    %176 = tpu.matmul %175, %83, %cst_153 {dimension_numbers = #tpu.dot_dimension_numbers<[1], [0], [0], [1], [0, 0, 1, 1], [], []>} : vector<4x16xf32>, vector<16x98xf32>, vector<4x98xf32> -> vector<4x98xf32>
    %177 = arith.addf %173, %176 : vector<4x98xf32>
    %178 = arith.maximumf %140, %177 : vector<4x98xf32>
    %cst_154 = arith.constant 0.000000e+00 : f32
    %179 = vector.broadcast %cst_154 : f32 to vector<4x98xf32>
    %c0_155 = arith.constant 0 : index
    %c0_156 = arith.constant 0 : index
    %c0_157 = arith.constant 0 : index
    %180 = vector.load %arg4[%c0_155, %c0_156, %c0_157] : memref<9x4x16xf32, #tpu.memory_space<vmem>>, vector<1x4x16xf32>
    %181 = vector.shape_cast %180 : vector<1x4x16xf32> to vector<4x16xf32>
    %cst_158 = arith.constant dense<0.000000e+00> : vector<4x98xf32>
    %182 = tpu.matmul %181, %48, %cst_158 {dimension_numbers = #tpu.dot_dimension_numbers<[1], [0], [0], [1], [0, 0, 1, 1], [], []>} : vector<4x16xf32>, vector<16x98xf32>, vector<4x98xf32> -> vector<4x98xf32>
    %183 = arith.addf %179, %182 : vector<4x98xf32>
    %c1_159 = arith.constant 1 : index
    %c0_160 = arith.constant 0 : index
    %c0_161 = arith.constant 0 : index
    %184 = vector.load %arg4[%c1_159, %c0_160, %c0_161] : memref<9x4x16xf32, #tpu.memory_space<vmem>>, vector<1x4x16xf32>
    %185 = vector.shape_cast %184 : vector<1x4x16xf32> to vector<4x16xf32>
    %cst_162 = arith.constant dense<0.000000e+00> : vector<4x98xf32>
    %186 = tpu.matmul %185, %53, %cst_162 {dimension_numbers = #tpu.dot_dimension_numbers<[1], [0], [0], [1], [0, 0, 1, 1], [], []>} : vector<4x16xf32>, vector<16x98xf32>, vector<4x98xf32> -> vector<4x98xf32>
    %187 = arith.addf %183, %186 : vector<4x98xf32>
    %c2_163 = arith.constant 2 : index
    %c0_164 = arith.constant 0 : index
    %c0_165 = arith.constant 0 : index
    %188 = vector.load %arg4[%c2_163, %c0_164, %c0_165] : memref<9x4x16xf32, #tpu.memory_space<vmem>>, vector<1x4x16xf32>
    %189 = vector.shape_cast %188 : vector<1x4x16xf32> to vector<4x16xf32>
    %cst_166 = arith.constant dense<0.000000e+00> : vector<4x98xf32>
    %190 = tpu.matmul %189, %58, %cst_166 {dimension_numbers = #tpu.dot_dimension_numbers<[1], [0], [0], [1], [0, 0, 1, 1], [], []>} : vector<4x16xf32>, vector<16x98xf32>, vector<4x98xf32> -> vector<4x98xf32>
    %191 = arith.addf %187, %190 : vector<4x98xf32>
    %c3_167 = arith.constant 3 : index
    %c0_168 = arith.constant 0 : index
    %c0_169 = arith.constant 0 : index
    %192 = vector.load %arg4[%c3_167, %c0_168, %c0_169] : memref<9x4x16xf32, #tpu.memory_space<vmem>>, vector<1x4x16xf32>
    %193 = vector.shape_cast %192 : vector<1x4x16xf32> to vector<4x16xf32>
    %cst_170 = arith.constant dense<0.000000e+00> : vector<4x98xf32>
    %194 = tpu.matmul %193, %68, %cst_170 {dimension_numbers = #tpu.dot_dimension_numbers<[1], [0], [0], [1], [0, 0, 1, 1], [], []>} : vector<4x16xf32>, vector<16x98xf32>, vector<4x98xf32> -> vector<4x98xf32>
    %195 = arith.addf %191, %194 : vector<4x98xf32>
    %c4_171 = arith.constant 4 : index
    %c0_172 = arith.constant 0 : index
    %c0_173 = arith.constant 0 : index
    %196 = vector.load %arg4[%c4_171, %c0_172, %c0_173] : memref<9x4x16xf32, #tpu.memory_space<vmem>>, vector<1x4x16xf32>
    %197 = vector.shape_cast %196 : vector<1x4x16xf32> to vector<4x16xf32>
    %cst_174 = arith.constant dense<0.000000e+00> : vector<4x98xf32>
    %198 = tpu.matmul %197, %73, %cst_174 {dimension_numbers = #tpu.dot_dimension_numbers<[1], [0], [0], [1], [0, 0, 1, 1], [], []>} : vector<4x16xf32>, vector<16x98xf32>, vector<4x98xf32> -> vector<4x98xf32>
    %199 = arith.addf %195, %198 : vector<4x98xf32>
    %c5_175 = arith.constant 5 : index
    %c0_176 = arith.constant 0 : index
    %c0_177 = arith.constant 0 : index
    %200 = vector.load %arg4[%c5_175, %c0_176, %c0_177] : memref<9x4x16xf32, #tpu.memory_space<vmem>>, vector<1x4x16xf32>
    %201 = vector.shape_cast %200 : vector<1x4x16xf32> to vector<4x16xf32>
    %cst_178 = arith.constant dense<0.000000e+00> : vector<4x98xf32>
    %202 = tpu.matmul %201, %78, %cst_178 {dimension_numbers = #tpu.dot_dimension_numbers<[1], [0], [0], [1], [0, 0, 1, 1], [], []>} : vector<4x16xf32>, vector<16x98xf32>, vector<4x98xf32> -> vector<4x98xf32>
    %203 = arith.addf %199, %202 : vector<4x98xf32>
    %c6_179 = arith.constant 6 : index
    %c0_180 = arith.constant 0 : index
    %c0_181 = arith.constant 0 : index
    %204 = vector.load %arg4[%c6_179, %c0_180, %c0_181] : memref<9x4x16xf32, #tpu.memory_space<vmem>>, vector<1x4x16xf32>
    %205 = vector.shape_cast %204 : vector<1x4x16xf32> to vector<4x16xf32>
    %cst_182 = arith.constant dense<0.000000e+00> : vector<4x98xf32>
    %206 = tpu.matmul %205, %88, %cst_182 {dimension_numbers = #tpu.dot_dimension_numbers<[1], [0], [0], [1], [0, 0, 1, 1], [], []>} : vector<4x16xf32>, vector<16x98xf32>, vector<4x98xf32> -> vector<4x98xf32>
    %207 = arith.addf %203, %206 : vector<4x98xf32>
    %c7_183 = arith.constant 7 : index
    %c0_184 = arith.constant 0 : index
    %c0_185 = arith.constant 0 : index
    %208 = vector.load %arg4[%c7_183, %c0_184, %c0_185] : memref<9x4x16xf32, #tpu.memory_space<vmem>>, vector<1x4x16xf32>
    %209 = vector.shape_cast %208 : vector<1x4x16xf32> to vector<4x16xf32>
    %cst_186 = arith.constant dense<0.000000e+00> : vector<4x98xf32>
    %210 = tpu.matmul %209, %93, %cst_186 {dimension_numbers = #tpu.dot_dimension_numbers<[1], [0], [0], [1], [0, 0, 1, 1], [], []>} : vector<4x16xf32>, vector<16x98xf32>, vector<4x98xf32> -> vector<4x98xf32>
    %211 = arith.addf %207, %210 : vector<4x98xf32>
    %c8_187 = arith.constant 8 : index
    %c0_188 = arith.constant 0 : index
    %c0_189 = arith.constant 0 : index
    %212 = vector.load %arg4[%c8_187, %c0_188, %c0_189] : memref<9x4x16xf32, #tpu.memory_space<vmem>>, vector<1x4x16xf32>
    %213 = vector.shape_cast %212 : vector<1x4x16xf32> to vector<4x16xf32>
    %cst_190 = arith.constant dense<0.000000e+00> : vector<4x98xf32>
    %214 = tpu.matmul %213, %98, %cst_190 {dimension_numbers = #tpu.dot_dimension_numbers<[1], [0], [0], [1], [0, 0, 1, 1], [], []>} : vector<4x16xf32>, vector<16x98xf32>, vector<4x98xf32> -> vector<4x98xf32>
    %215 = arith.addf %211, %214 : vector<4x98xf32>
    %216 = arith.maximumf %178, %215 : vector<4x98xf32>
    %cst_191 = arith.constant 0.000000e+00 : f32
    %217 = vector.broadcast %cst_191 : f32 to vector<4x98xf32>
    %c0_192 = arith.constant 0 : index
    %c0_193 = arith.constant 0 : index
    %c0_194 = arith.constant 0 : index
    %218 = vector.load %arg4[%c0_192, %c0_193, %c0_194] : memref<9x4x16xf32, #tpu.memory_space<vmem>>, vector<1x4x16xf32>
    %219 = vector.shape_cast %218 : vector<1x4x16xf32> to vector<4x16xf32>
    %cst_195 = arith.constant dense<0.000000e+00> : vector<4x98xf32>
    %220 = tpu.matmul %219, %53, %cst_195 {dimension_numbers = #tpu.dot_dimension_numbers<[1], [0], [0], [1], [0, 0, 1, 1], [], []>} : vector<4x16xf32>, vector<16x98xf32>, vector<4x98xf32> -> vector<4x98xf32>
    %221 = arith.addf %217, %220 : vector<4x98xf32>
    %c1_196 = arith.constant 1 : index
    %c0_197 = arith.constant 0 : index
    %c0_198 = arith.constant 0 : index
    %222 = vector.load %arg4[%c1_196, %c0_197, %c0_198] : memref<9x4x16xf32, #tpu.memory_space<vmem>>, vector<1x4x16xf32>
    %223 = vector.shape_cast %222 : vector<1x4x16xf32> to vector<4x16xf32>
    %cst_199 = arith.constant dense<0.000000e+00> : vector<4x98xf32>
    %224 = tpu.matmul %223, %58, %cst_199 {dimension_numbers = #tpu.dot_dimension_numbers<[1], [0], [0], [1], [0, 0, 1, 1], [], []>} : vector<4x16xf32>, vector<16x98xf32>, vector<4x98xf32> -> vector<4x98xf32>
    %225 = arith.addf %221, %224 : vector<4x98xf32>
    %c2_200 = arith.constant 2 : index
    %c0_201 = arith.constant 0 : index
    %c0_202 = arith.constant 0 : index
    %226 = vector.load %arg4[%c2_200, %c0_201, %c0_202] : memref<9x4x16xf32, #tpu.memory_space<vmem>>, vector<1x4x16xf32>
    %227 = vector.shape_cast %226 : vector<1x4x16xf32> to vector<4x16xf32>
    %cst_203 = arith.constant dense<0.000000e+00> : vector<4x98xf32>
    %228 = tpu.matmul %227, %63, %cst_203 {dimension_numbers = #tpu.dot_dimension_numbers<[1], [0], [0], [1], [0, 0, 1, 1], [], []>} : vector<4x16xf32>, vector<16x98xf32>, vector<4x98xf32> -> vector<4x98xf32>
    %229 = arith.addf %225, %228 : vector<4x98xf32>
    %c3_204 = arith.constant 3 : index
    %c0_205 = arith.constant 0 : index
    %c0_206 = arith.constant 0 : index
    %230 = vector.load %arg4[%c3_204, %c0_205, %c0_206] : memref<9x4x16xf32, #tpu.memory_space<vmem>>, vector<1x4x16xf32>
    %231 = vector.shape_cast %230 : vector<1x4x16xf32> to vector<4x16xf32>
    %cst_207 = arith.constant dense<0.000000e+00> : vector<4x98xf32>
    %232 = tpu.matmul %231, %73, %cst_207 {dimension_numbers = #tpu.dot_dimension_numbers<[1], [0], [0], [1], [0, 0, 1, 1], [], []>} : vector<4x16xf32>, vector<16x98xf32>, vector<4x98xf32> -> vector<4x98xf32>
    %233 = arith.addf %229, %232 : vector<4x98xf32>
    %c4_208 = arith.constant 4 : index
    %c0_209 = arith.constant 0 : index
    %c0_210 = arith.constant 0 : index
    %234 = vector.load %arg4[%c4_208, %c0_209, %c0_210] : memref<9x4x16xf32, #tpu.memory_space<vmem>>, vector<1x4x16xf32>
    %235 = vector.shape_cast %234 : vector<1x4x16xf32> to vector<4x16xf32>
    %cst_211 = arith.constant dense<0.000000e+00> : vector<4x98xf32>
    %236 = tpu.matmul %235, %78, %cst_211 {dimension_numbers = #tpu.dot_dimension_numbers<[1], [0], [0], [1], [0, 0, 1, 1], [], []>} : vector<4x16xf32>, vector<16x98xf32>, vector<4x98xf32> -> vector<4x98xf32>
    %237 = arith.addf %233, %236 : vector<4x98xf32>
    %c5_212 = arith.constant 5 : index
    %c0_213 = arith.constant 0 : index
    %c0_214 = arith.constant 0 : index
    %238 = vector.load %arg4[%c5_212, %c0_213, %c0_214] : memref<9x4x16xf32, #tpu.memory_space<vmem>>, vector<1x4x16xf32>
    %239 = vector.shape_cast %238 : vector<1x4x16xf32> to vector<4x16xf32>
    %cst_215 = arith.constant dense<0.000000e+00> : vector<4x98xf32>
    %240 = tpu.matmul %239, %83, %cst_215 {dimension_numbers = #tpu.dot_dimension_numbers<[1], [0], [0], [1], [0, 0, 1, 1], [], []>} : vector<4x16xf32>, vector<16x98xf32>, vector<4x98xf32> -> vector<4x98xf32>
    %241 = arith.addf %237, %240 : vector<4x98xf32>
    %c6_216 = arith.constant 6 : index
    %c0_217 = arith.constant 0 : index
    %c0_218 = arith.constant 0 : index
    %242 = vector.load %arg4[%c6_216, %c0_217, %c0_218] : memref<9x4x16xf32, #tpu.memory_space<vmem>>, vector<1x4x16xf32>
    %243 = vector.shape_cast %242 : vector<1x4x16xf32> to vector<4x16xf32>
    %cst_219 = arith.constant dense<0.000000e+00> : vector<4x98xf32>
    %244 = tpu.matmul %243, %93, %cst_219 {dimension_numbers = #tpu.dot_dimension_numbers<[1], [0], [0], [1], [0, 0, 1, 1], [], []>} : vector<4x16xf32>, vector<16x98xf32>, vector<4x98xf32> -> vector<4x98xf32>
    %245 = arith.addf %241, %244 : vector<4x98xf32>
    %c7_220 = arith.constant 7 : index
    %c0_221 = arith.constant 0 : index
    %c0_222 = arith.constant 0 : index
    %246 = vector.load %arg4[%c7_220, %c0_221, %c0_222] : memref<9x4x16xf32, #tpu.memory_space<vmem>>, vector<1x4x16xf32>
    %247 = vector.shape_cast %246 : vector<1x4x16xf32> to vector<4x16xf32>
    %cst_223 = arith.constant dense<0.000000e+00> : vector<4x98xf32>
    %248 = tpu.matmul %247, %98, %cst_223 {dimension_numbers = #tpu.dot_dimension_numbers<[1], [0], [0], [1], [0, 0, 1, 1], [], []>} : vector<4x16xf32>, vector<16x98xf32>, vector<4x98xf32> -> vector<4x98xf32>
    %249 = arith.addf %245, %248 : vector<4x98xf32>
    %c8_224 = arith.constant 8 : index
    %c0_225 = arith.constant 0 : index
    %c0_226 = arith.constant 0 : index
    %250 = vector.load %arg4[%c8_224, %c0_225, %c0_226] : memref<9x4x16xf32, #tpu.memory_space<vmem>>, vector<1x4x16xf32>
    %251 = vector.shape_cast %250 : vector<1x4x16xf32> to vector<4x16xf32>
    %cst_227 = arith.constant dense<0.000000e+00> : vector<4x98xf32>
    %252 = tpu.matmul %251, %103, %cst_227 {dimension_numbers = #tpu.dot_dimension_numbers<[1], [0], [0], [1], [0, 0, 1, 1], [], []>} : vector<4x16xf32>, vector<16x98xf32>, vector<4x98xf32> -> vector<4x98xf32>
    %253 = arith.addf %249, %252 : vector<4x98xf32>
    %254 = arith.maximumf %216, %253 : vector<4x98xf32>
    %c0_228 = arith.constant 0 : index
    %c0_229 = arith.constant 0 : index
    %255 = vector.load %arg5[%c0_228, %c0_229] : memref<4x1xf32, #tpu.memory_space<vmem>>, vector<4x1xf32>
    %256 = vector.broadcast %255 : vector<4x1xf32> to vector<4x98xf32>
    %257 = arith.addf %254, %256 : vector<4x98xf32>
    %cst_230 = arith.constant 0.000000e+00 : f32
    %258 = vector.broadcast %cst_230 : f32 to vector<4x98xf32>
    %259 = arith.maximumf %257, %258 : vector<4x98xf32>
    %c0_231 = arith.constant 0 : index
    %c0_232 = arith.constant 0 : index
    %260 = vector.load %arg13[%c0_231, %c0_232] : memref<4x98xf32, #tpu.memory_space<vmem>>, vector<4x98xf32>
    tpu.vector_store %arg13[%c0_231, %c0_232], %259 {strides = array<i32>} : memref<4x98xf32, #tpu.memory_space<vmem>>, vector<4x98xf32>,
    %c0_233 = arith.constant 0 : index
    %c0_234 = arith.constant 0 : index
    %261 = vector.load %arg13[%c0_233, %c0_234] : memref<4x98xf32, #tpu.memory_space<vmem>>, vector<1x49xf32>
    %c1_235 = arith.constant 1 : index
    %c0_236 = arith.constant 0 : index
    %262 = vector.load %arg13[%c1_235, %c0_236] : memref<4x98xf32, #tpu.memory_space<vmem>>, vector<1x49xf32>
    %c2_237 = arith.constant 2 : index
    %c0_238 = arith.constant 0 : index
    %263 = vector.load %arg13[%c2_237, %c0_238] : memref<4x98xf32, #tpu.memory_space<vmem>>, vector<1x49xf32>
    %c3_239 = arith.constant 3 : index
    %c0_240 = arith.constant 0 : index
    %264 = vector.load %arg13[%c3_239, %c0_240] : memref<4x98xf32, #tpu.memory_space<vmem>>, vector<1x49xf32>
    %265 = tpu.concatenate %261, %262, %263, %264 in 1 : vector<1x49xf32>, vector<1x49xf32>, vector<1x49xf32>, vector<1x49xf32> -> vector<1x196xf32>
    %c0_241 = arith.constant 0 : index
    %c49 = arith.constant 49 : index
    %266 = vector.load %arg13[%c0_241, %c49] : memref<4x98xf32, #tpu.memory_space<vmem>>, vector<1x49xf32>
    %c1_242 = arith.constant 1 : index
    %c49_243 = arith.constant 49 : index
    %267 = vector.load %arg13[%c1_242, %c49_243] : memref<4x98xf32, #tpu.memory_space<vmem>>, vector<1x49xf32>
    %c2_244 = arith.constant 2 : index
    %c49_245 = arith.constant 49 : index
    %268 = vector.load %arg13[%c2_244, %c49_245] : memref<4x98xf32, #tpu.memory_space<vmem>>, vector<1x49xf32>
    %c3_246 = arith.constant 3 : index
    %c49_247 = arith.constant 49 : index
    %269 = vector.load %arg13[%c3_246, %c49_247] : memref<4x98xf32, #tpu.memory_space<vmem>>, vector<1x49xf32>
    %270 = tpu.concatenate %266, %267, %268, %269 in 1 : vector<1x49xf32>, vector<1x49xf32>, vector<1x49xf32>, vector<1x49xf32> -> vector<1x196xf32>
    %271 = tpu.concatenate %265, %270 in 0 : vector<1x196xf32>, vector<1x196xf32> -> vector<2x196xf32>
    %c0_248 = arith.constant 0 : index
    %c0_249 = arith.constant 0 : index
    %272 = vector.load %arg7[%c0_248, %c0_249] : memref<196x192xf32, #tpu.memory_space<vmem>>, vector<196x192xf32>
    %cst_250 = arith.constant dense<0.000000e+00> : vector<2x192xf32>
    %273 = tpu.matmul %271, %272, %cst_250 {dimension_numbers = #tpu.dot_dimension_numbers<[1], [0], [0], [1], [0, 0, 1, 1], [], []>} : vector<2x196xf32>, vector<196x192xf32>, vector<2x192xf32> -> vector<2x192xf32>
    %c0_251 = arith.constant 0 : index
    %c0_252 = arith.constant 0 : index
    %274 = vector.load %arg8[%c0_251, %c0_252] : memref<1x192xf32, #tpu.memory_space<vmem>>, vector<1x192xf32>
    %275 = vector.broadcast %274 : vector<1x192xf32> to vector<2x192xf32>
    %276 = arith.addf %273, %275 : vector<2x192xf32>
    %cst_253 = arith.constant 0.000000e+00 : f32
    %277 = vector.broadcast %cst_253 : f32 to vector<2x192xf32>
    %278 = arith.maximumf %276, %277 : vector<2x192xf32>
    %c0_254 = arith.constant 0 : index
    %c0_255 = arith.constant 0 : index
    %279 = vector.load %arg9[%c0_254, %c0_255] : memref<192x12xf32, #tpu.memory_space<vmem>>, vector<192x12xf32>
    %cst_256 = arith.constant dense<0.000000e+00> : vector<2x12xf32>
    %280 = tpu.matmul %278, %279, %cst_256 {dimension_numbers = #tpu.dot_dimension_numbers<[1], [0], [0], [1], [0, 0, 1, 1], [], []>} : vector<2x192xf32>, vector<192x12xf32>, vector<2x12xf32> -> vector<2x12xf32>
    %c0_257 = arith.constant 0 : index
    %c0_258 = arith.constant 0 : index
    %281 = vector.load %arg10[%c0_257, %c0_258] : memref<1x12xf32, #tpu.memory_space<vmem>>, vector<1x12xf32>
    %282 = vector.broadcast %281 : vector<1x12xf32> to vector<2x12xf32>
    %283 = arith.addf %280, %282 : vector<2x12xf32>
    %284 = vector.extract_strided_slice %283 {offsets = [0, 0], sizes = [2, 10], strides = [1, 1]} : vector<2x12xf32> to vector<2x10xf32>
    %cst_259 = arith.constant dense<0xFF800000> : vector<2xf32>
    %285 = vector.multi_reduction <maximumf>, %284, %cst_259 [1] : vector<2x10xf32> to vector<2xf32>
    %286 = vector.shape_cast %285 : vector<2xf32> to vector<2x1xf32>
    %287 = vector.broadcast %286 : vector<2x1xf32> to vector<2x10xf32>
    %288 = arith.subf %284, %287 : vector<2x10xf32>
    %289 = math.exp %288 : vector<2x10xf32>
    %cst_260 = arith.constant dense<0.000000e+00> : vector<2xf32>
    %290 = vector.multi_reduction <add>, %289, %cst_260 [1] : vector<2x10xf32> to vector<2xf32>
    %291 = vector.shape_cast %290 : vector<2xf32> to vector<2x1xf32>
    %292 = math.log %291 : vector<2x1xf32>
    %293 = vector.broadcast %292 : vector<2x1xf32> to vector<2x10xf32>
    %294 = arith.subf %288, %293 : vector<2x10xf32>
    %295 = vector.extract_strided_slice %283 {offsets = [0, 10], sizes = [2, 2], strides = [1, 1]} : vector<2x12xf32> to vector<2x2xf32>
    %cst_261 = arith.constant dense<0xFF800000> : vector<2xf32>
    %296 = vector.multi_reduction <maximumf>, %295, %cst_261 [1] : vector<2x2xf32> to vector<2xf32>
    %297 = vector.shape_cast %296 : vector<2xf32> to vector<2x1xf32>
    %298 = vector.broadcast %297 : vector<2x1xf32> to vector<2x2xf32>
    %299 = arith.subf %295, %298 : vector<2x2xf32>
    %300 = math.exp %299 : vector<2x2xf32>
    %cst_262 = arith.constant dense<0.000000e+00> : vector<2xf32>
    %301 = vector.multi_reduction <add>, %300, %cst_262 [1] : vector<2x2xf32> to vector<2xf32>
    %302 = vector.shape_cast %301 : vector<2xf32> to vector<2x1xf32>
    %303 = math.log %302 : vector<2x1xf32>
    %304 = vector.broadcast %303 : vector<2x1xf32> to vector<2x2xf32>
    %305 = arith.subf %299, %304 : vector<2x2xf32>
    %306 = tpu.concatenate %294, %305 in 1 : vector<2x10xf32>, vector<2x2xf32> -> vector<2x12xf32>
    %c0_263 = arith.constant 0 : index
    %c0_264 = arith.constant 0 : index
    %307 = vector.load %arg11[%c0_263, %c0_264] : memref<2x12xf32, #tpu.memory_space<vmem>>, vector<2x12xf32>
    tpu.vector_store %arg11[%c0_263, %c0_264], %306 {strides = array<i32>} : memref<2x12xf32, #tpu.memory_space<vmem>>, vector<2x12xf32>,
    return
  }
  func.func @transform_0(%arg0: i32) -> (i32, i32, i32) {
    %c0_i32 = arith.constant 0 : i32
    %c0_i32_0 = arith.constant 0 : i32
    %c0_i32_1 = arith.constant 0 : i32
    %c0_i32_2 = arith.constant 0 : i32
    return %c0_i32, %c0_i32_0, %c0_i32_1 : i32, i32, i32
  }
  func.func @transform_1(%arg0: i32) -> (i32, i32) {
    %c0_i32 = arith.constant 0 : i32
    %c0_i32_0 = arith.constant 0 : i32
    %c0_i32_1 = arith.constant 0 : i32
    return %c0_i32, %c0_i32_0 : i32, i32
  }
  func.func @transform_2(%arg0: i32) -> (i32, i32) {
    %c0_i32 = arith.constant 0 : i32
    %c0_i32_0 = arith.constant 0 : i32
    %c0_i32_1 = arith.constant 0 : i32
    return %c0_i32, %c0_i32_0 : i32, i32
  }
  func.func @transform_3(%arg0: i32) -> (i32, i32, i32) {
    %c0_i32 = arith.constant 0 : i32
    %c0_i32_0 = arith.constant 0 : i32
    %c0_i32_1 = arith.constant 0 : i32
    %c0_i32_2 = arith.constant 0 : i32
    return %c0_i32, %c0_i32_0, %c0_i32_1 : i32, i32, i32
  }
  func.func @transform_4(%arg0: i32) -> (i32, i32) {
    %c0_i32 = arith.constant 0 : i32
    %c0_i32_0 = arith.constant 0 : i32
    %c0_i32_1 = arith.constant 0 : i32
    return %c0_i32, %c0_i32_0 : i32, i32
  }
  func.func @transform_5(%arg0: i32) -> (i32, i32, i32) {
    %c0_i32 = arith.constant 0 : i32
    %c0_i32_0 = arith.constant 0 : i32
    %c0_i32_1 = arith.constant 0 : i32
    %c0_i32_2 = arith.constant 0 : i32
    return %c0_i32, %c0_i32_0, %c0_i32_1 : i32, i32, i32
  }
  func.func @transform_6(%arg0: i32) -> (i32, i32) {
    %c0_i32 = arith.constant 0 : i32
    %c0_i32_0 = arith.constant 0 : i32
    %c0_i32_1 = arith.constant 0 : i32
    return %c0_i32, %c0_i32_0 : i32, i32
  }
  func.func @transform_7(%arg0: i32) -> (i32, i32) {
    %c0_i32 = arith.constant 0 : i32
    %c0_i32_0 = arith.constant 0 : i32
    %c0_i32_1 = arith.constant 0 : i32
    return %c0_i32, %c0_i32_0 : i32, i32
  }
  func.func @transform_8(%arg0: i32) -> (i32, i32) {
    %c0_i32 = arith.constant 0 : i32
    %c0_i32_0 = arith.constant 0 : i32
    %c0_i32_1 = arith.constant 0 : i32
    return %c0_i32, %c0_i32_0 : i32, i32
  }
  func.func @transform_9(%arg0: i32) -> (i32, i32) {
    %c0_i32 = arith.constant 0 : i32
    %c0_i32_0 = arith.constant 0 : i32
    %c0_i32_1 = arith.constant 0 : i32
    return %c0_i32, %c0_i32_0 : i32, i32
  }
  func.func @transform_10(%arg0: i32) -> (i32, i32) {
    %c0_i32 = arith.constant 0 : i32
    %c0_i32_0 = arith.constant 0 : i32
    %c0_i32_1 = arith.constant 0 : i32
    return %c0_i32, %c0_i32_0 : i32, i32
  }
}

</mosaic_0001>

<bundles_post_ra>
// kernel: dann_forward_prepared.1
= control target key start
LH: loop header
LB: loop body
LE: loop exit
PB: predicated region body
PF: predicated region fallthrough
CT: control target
= control target key end

     0   :  { %vm52_vm0 = vcmask 1040384   ;;  %vm5107_vm1 = vmmov 1   ;;  %v5108_v3 = vmov 0.0   ;;  %v5109_v8 = vmov 0   ;;  %s5110_s16 = smov 61   ;;  %s5111_s26 = smov 31   ;;  %s6076_s0 = inlined_call_operand.vmem [shape: f32[4,9,392], index: 0, kind: input, shape index: {}]   ;;  %s6077_s1 = inlined_call_operand.vmem [shape: f32[16,9], index: 1, kind: input, shape index: {}]   ;;  %s6078_s2 = inlined_call_operand.vmem [shape: f32[16,1], index: 2, kind: input, shape index: {}]   ;;  %s6079_s5 = inlined_call_operand.vmem [shape: f32[9,1,98], index: 5, kind: input, shape index: {}]   ;;  %s6080_s3 = inlined_call_operand.vmem [shape: f32[9,4,16], index: 3, kind: input, shape index: {}]   ;;  %s6081_s4 = inlined_call_operand.vmem [shape: f32[4,1], index: 4, kind: input, shape index: {}]   ;;  %s6082_s6 = inlined_call_operand.vmem [shape: f32[196,192], index: 6, kind: input, shape index: {}]   ;;  %s6083_s8 = inlined_call_operand.vmem [shape: f32[192,12], index: 8, kind: input, shape index: {}]   ;;  %s6084_s7 = inlined_call_operand.vmem [shape: f32[1,192], index: 7, kind: input, shape index: {}]   ;;  %s6085_s9 = inlined_call_operand.vmem [shape: f32[1,12], index: 9, kind: input, shape index: {}]   ;;  %s6086_s10 = inlined_call_operand.vmem [shape: f32[2,12], index: 10, kind: output, shape index: {}]  }
   0x1   :  { %v38_v0 = vld [vmem:[%s6076_s0 + $0x8] sm:$0xff]  ;;  %vm5204_vm2 = vmpackc.low %vm52_vm0, %vm5107_vm1  ;;  %129 = vmatprep.mubr.f32.mxu0 %v5108_v3  ;;  %796 = vst [vmem:[#allocation2] sm:$0xff] %v5108_v3  ;;  %206 = vmatprep.mubr.f32.mxu1 %v5108_v3  ;;  %v40_v5 = vld [vmem:[%s6076_s0 + $0x18] sm:$0xff]  ;;  %vm45_vm3 = vcmask 72704   ;;  %s5112_s29 = smov 62   ;;  %s5113_s30 = smov 30  }
   0x2   :  { %v42_v1 = vld [vmem:[%s6076_s0 + $0x28] sm:$0x1]  ;;  %800 = vst [vmem:[#allocation2 + $0x20] sm:$0xff] %v5108_v3  ;;  %807 = vst [vmem:[#allocation2 + $0x50] sm:$0xff] %v5108_v3  ;;  %v44_v6 = vld [vmem:[%s6076_s0 + $0x38] sm:$0x1]  ;;  %4966 = vset.pattern.permute.xlu0 %v5109_v8  ;;  %5097 = vset.pattern.permute.xlu1 %v5109_v8 }
   0x3   :  { %v4627_v4 = vpack.c.bf16 %v42_v1, %v38_v0  ;;  %v37_v7 = vld [vmem:[%s6076_s0] sm:$0xff]  ;;  %v4633_v9 = vpack.c.bf16 %v44_v6, %v40_v5  ;;  %v39_v11 = vld [vmem:[%s6076_s0 + $0x10] sm:$0xff]  ;;  %v4154_v16 = vld [vmem:[%s6076_s0 + $0x48] sm:$0xff]  ;;  %s5114_s15 = smov 98   ;;  %s5116_s19 = smov 37   ;;  %vm801_vm4 = vcmask 64512  }
   0x4   :  { %v41_v10 = vld [vmem:[%s6076_s0 + $0x20] sm:$0x1]  ;;  %v43_v12 = vld [vmem:[%s6076_s0 + $0x30] sm:$0x1]  ;;  %v4158_v17 = vld [vmem:[%s6076_s0 + $0x68] sm:$0x1] }
   0x5   :  { %4629 = vmatprep.subr.msk.bf16.mxu0 %vm5204_vm2, %v4627_v4  ;;  %v4630_v13 = vpack.c.bf16 %v41_v10, %v37_v7  ;;  %v4636_v14 = vpack.c.bf16 %v43_v12, %v39_v11  ;;  %v5236_v15 = vld [vmem:[%s6077_s1] sm:$0xff]  ;;  %4635 = vmatprep.subr.msk.bf16.mxu1 %vm5204_vm2, %v4633_v9  ;;  %v4156_v18 = vld [vmem:[%s6076_s0 + $0x58] sm:$0xff]  ;;  %v4639_v20 = vpack.c.bf16 %v4158_v17, %v4154_v16  ;;  %v4155_v24 = vld [vmem:[%s6076_s0 + $0x50] sm:$0xff]  ;;  %s5117_s20 = smov 1   ;;  %s5118_s21 = smov 38   ;;  %vm5122_vm5 = vmmov 0  }
   0x6   :  { %v4160_v19 = vld [vmem:[%s6076_s0 + $0x78] sm:$0x1]  ;;  %v4153_v22 = vld [vmem:[%s6076_s0 + $0x40] sm:$0xff]  ;;  %v4159_v26 = vld [vmem:[%s6076_s0 + $0x70] sm:$0x1]  ;;  %s5119_s22 = smov 68  }
   0x7   :  { %4632 = vmatpush1.bf16.msk.msra.mxu0 %vm5204_vm2, %v4630_v13  ;;  %4638 = vmatpush1.bf16.msk.msra.mxu1 %vm5204_vm2, %v4636_v14  ;;  %v4645_v21 = vpack.c.bf16 %v4160_v19, %v4156_v18  ;;  %v4157_v23 = vld [vmem:[%s6076_s0 + $0x60] sm:$0x1]  ;;  %v4170_v27 = vld [vmem:[%s6076_s0 + $0x88] sm:$0xff]  ;;  %v4648_v29 = vpack.c.bf16 %v4159_v26, %v4155_v24  ;;  %v4172_v31 = vld [vmem:[%s6076_s0 + $0x98] sm:$0xff]  ;;  %s5123_s23 = smov 69   ;;  %s5124_s24 = smov 66  }
   0x8   :  { %v4642_v25 = vpack.c.bf16 %v4157_v23, %v4153_v22  ;;  %v4174_v28 = vld [vmem:[%s6076_s0 + $0xa8] sm:$0x1]  ;;  %4641 = vmatprep.subr.msk.bf16.mxu0 %vm5204_vm2, %v4639_v20  ;;  %v4176_v32 = vld [vmem:[%s6076_s0 + $0xb8] sm:$0x1]  ;;  %v4169_v35 = vld [vmem:[%s6076_s0 + $0x80] sm:$0xff]  ;;  %s5125_s25 = smov 127  }
   0x9   :  { %4647 = vmatprep.subr.msk.bf16.mxu1 %vm5204_vm2, %v4645_v21  ;;  %v4651_v30 = vpack.c.bf16 %v4174_v28, %v4170_v27  ;;  %v4657_v33 = vpack.c.bf16 %v4176_v32, %v4172_v31  ;;  %v5293_v34 = vld [vmem:[%s6077_s1 + $0x8] sm:$0xff]  ;;  %v4173_v36 = vld [vmem:[%s6076_s0 + $0xa0] sm:$0x1]  ;;  %v4171_v37 = vld [vmem:[%s6076_s0 + $0x90] sm:$0xff]  ;;  %s5120_s1 = smov 67   ;;  %s5128_s28 = smov 104  }
   0xa   :  { %4147 = vmatmul.mubr.msk.f32.vlgmr.msra.gmra.mrb[0].mxu0 %vm45_vm3, %v5236_v15  ;;  %4151 = vmatmul.mubr.msk.f32.vlgmr.msra.gmra.mrb[0].mxu1 %vm45_vm3, %v5236_v15  ;;  %v4175_v38 = vld [vmem:[%s6076_s0 + $0xb0] sm:$0x1]  ;;  %v4186_v39 = vld [vmem:[%s6076_s0 + $0xc8] sm:$0xff]  ;;  %v768_v41 = vld [vmem:[%s6078_s2] sm:$0xff]  ;;  %v4654_v45 = vpack.c.bf16 %v4173_v36, %v4169_v35  ;;  %s5130_s12 = smov 7   ;;  %s5131_s13 = smov 105  }
   0xb   :  { %135 = vmatprep.mubr.f32.mxu0 %v5108_v3  ;;  %212 = vmatprep.mubr.f32.mxu1 %v5108_v3  ;;  %v4190_v40 = vld [vmem:[%s6076_s0 + $0xe8] sm:$0x1]  ;;  %v4188_v42 = vld [vmem:[%s6076_s0 + $0xd8] sm:$0xff]  ;;  %v4203_v44 = vld [vmem:[%s6079_s5 + $0x1] ss:$0 sm:$0xff]  ;;  %v4660_v46 = vpack.c.bf16 %v4175_v38, %v4171_v37  ;;  %vm1002_vm6 = vcmask 547840  }
   0xc   :  { %4644 = vmatpush1.bf16.msk.msra.mxu0 %vm5204_vm2, %v4642_v25  ;;  %4650 = vmatpush1.bf16.msk.msra.mxu1 %vm5204_vm2, %v4648_v29  ;;  %v4192_v43 = vld [vmem:[%s6076_s0 + $0xf8] sm:$0x1]  ;;  %v4663_v47 = vpack.c.bf16 %v4190_v40, %v4186_v39  ;;  %v4185_v49 = vld [vmem:[%s6076_s0 + $0xc0] sm:$0xff]  ;;  %v4187_v51 = vld [vmem:[%s6076_s0 + $0xd0] sm:$0xff]  ;;  %vm1176_vm7 = vcmask 793600   ;;  %vm1007_vm8 = vcmask 130048  }
   0xd   :  { %4653 = vmatprep.subr.msk.bf16.mxu0 %vm5204_vm2, %v4651_v30  ;;  %4659 = vmatprep.subr.msk.bf16.mxu1 %vm5204_vm2, %v4657_v33  ;;  %v4669_v48 = vpack.c.bf16 %v4192_v43, %v4188_v42  ;;  %v4189_v50 = vld [vmem:[%s6076_s0 + $0xe0] sm:$0x1]  ;;  %v4191_v52 = vld [vmem:[%s6076_s0 + $0xf0] sm:$0x1]  ;;  %v769_v53 = vld [vmem:[%s6078_s2 + $0x8] sm:$0xff]  ;;  %s5127_s0 = smov 60  }
   0xe   :  { %4148 = vmatmul.mubr.msk.f32.gmra.mrb[2].mxu0 %vm45_vm3, %v5293_v34  ;;  %4152 = vmatmul.mubr.msk.f32.gmra.mrb[2].mxu1 %vm45_vm3, %v5293_v34  ;;  %v4666_v54 = vpack.c.bf16 %v4189_v50, %v4185_v49  ;;  %v4672_v55 = vpack.c.bf16 %v4191_v52, %v4187_v51  ;;  %v4205_v56 = vld [vmem:[%s6079_s5 + $0x2] ss:$0 sm:$0xff]  ;;  %v4201_v57 = vld [vmem:[%s6079_s5] ss:$0 sm:$0xff]  ;;  %v5399_v58 = vld [vmem:[%s6079_s5 + $0x4] ss:$0 sm:$0xff] }
   0xf   :  { %304 = vmatprep.mubr.f32.mxu0 %v5108_v3  ;;  %381 = vmatprep.mubr.f32.mxu1 %v5108_v3  ;;  %v4207_v59 = vld [vmem:[%s6079_s5 + $0x3] ss:$0 sm:$0xff]  ;;  %v5416_v60 = vld [vmem:[%s6079_s5 + $0x5] ss:$0 sm:$0xff]  ;;  %s5132_s17 = smov 59   ;;  %vm1948_vm9 = vcmask 539648  }
  0x10   :  { %772 = vperm.xlu0 %4966, %v768_v41   ;;  %839 = vrot.lane.b32.xlu1 %v4203_v44, %s5110_s16  ;;  %s5115_s16 = smov 97   ;;  %vm1269_vm10 = vcmask 252928   ;;  %vm1438_vm11 = vcmask 244736   ;;  %vm1531_vm12 = vcmask 744448   ;;  %s5135_s2 = smov 121   ;;  %vm1624_vm13 = vcmask 490496  }
  0x11   :  { %s5136_s27 = smov 23   ;;  %vm1717_vm14 = vcmask 736256   ;;  %vm2399_vm15 = vcmask 482304   ;;  %vm2912_vm1 = vcmask 195584  }
  0x12   :  { %4163 = vmatmul.mubr.msk.f32.vlgmr.msra.gmra.mrb[4].mxu0 %vm45_vm3, %v5236_v15  ;;  %4167 = vmatmul.mubr.msk.f32.vlgmr.msra.gmra.mrb[4].mxu1 %vm45_vm3, %v5236_v15 }
  0x13   :  { %310 = vmatprep.mubr.f32.mxu0 %v5108_v3  ;;  %387 = vmatprep.mubr.f32.mxu1 %v5108_v3 }
  0x14   :  { %4656 = vmatpush1.bf16.msk.msra.mxu0 %vm5204_vm2, %v4654_v45  ;;  %4662 = vmatpush1.bf16.msk.msra.mxu1 %vm5204_vm2, %v4660_v46 }
  0x15   :  { %4665 = vmatprep.subr.msk.bf16.mxu0 %vm5204_vm2, %v4663_v47  ;;  %4671 = vmatprep.subr.msk.bf16.mxu1 %vm5204_vm2, %v4669_v48 }
  0x16   :  { %4164 = vmatmul.mubr.msk.f32.gmra.mrb[6].mxu0 %vm45_vm3, %v5293_v34  ;;  %4168 = vmatmul.mubr.msk.f32.gmra.mrb[6].mxu1 %vm45_vm3, %v5293_v34 }
  0x17   :  { %487 = vmatprep.mubr.f32.mxu0 %v5108_v3  ;;  %564 = vmatprep.mubr.f32.mxu1 %v5108_v3 }
  0x18   :  { %777 = vperm.xlu0 %4966, %v769_v53   ;;  %848 = vrot.lane.b32.xlu1 %v4203_v44, %s5111_s26 }
  0x1a   :  { %4179 = vmatmul.mubr.msk.f32.vlgmr.msra.gmra.mrb[8].mxu0 %vm45_vm3, %v5236_v15  ;;  %4183 = vmatmul.mubr.msk.f32.vlgmr.msra.gmra.mrb[8].mxu1 %vm45_vm3, %v5236_v15 }
  0x1b   :  { %493 = vmatprep.mubr.f32.mxu0 %v5108_v3  ;;  %570 = vmatprep.mubr.f32.mxu1 %v5108_v3 }
  0x1c   :  { %4668 = vmatpush1.bf16.msk.msra.mxu0 %vm5204_vm2, %v4666_v54  ;;  %4674 = vmatpush1.bf16.msk.msra.mxu1 %vm5204_vm2, %v4672_v55  ;;  %vm3079_vm2 = vcmask 187392  }
  0x1d   :  { %862 = vrot.lane.b32.xlu1 %v4205_v56, %s5112_s29  ;;  %825 = vrot.lane.b32.xlu0 %v4201_v57, %s5113_s30  ;;  %s5129_s29 = smov 90  }
  0x1e   :  { %4180 = vmatmul.mubr.msk.f32.gmra.mrb[10].mxu0 %vm45_vm3, %v5293_v34  ;;  %4184 = vmatmul.mubr.msk.f32.gmra.mrb[10].mxu1 %vm45_vm3, %v5293_v34 }
  0x1f   :  { %670 = vmatprep.mubr.f32.mxu0 %v5108_v3  ;;  %747 = vmatprep.mubr.f32.mxu1 %v5108_v3 }
  0x21   :  { %895 = vrot.lane.b32.xlu1 %v5399_v58, %s5114_s15  ;;  %878 = vrot.lane.b32.xlu0 %v4207_v59, %s5115_s16 }
  0x22   :  { %4195 = vmatmul.mubr.msk.f32.vlgmr.msra.gmra.mrb[12].mxu0 %vm45_vm3, %v5236_v15  ;;  %4199 = vmatmul.mubr.msk.f32.vlgmr.msra.gmra.mrb[12].mxu1 %vm45_vm3, %v5236_v15 }
  0x23   :  { %676 = vmatprep.mubr.f32.mxu0 %v5108_v3  ;;  %753 = vmatprep.mubr.f32.mxu1 %v5108_v3 }
  0x25   :  { %914 = vrot.lane.b32.xlu1 %v4207_v59, %s5116_s19  ;;  %909 = vrot.lane.b32.xlu0 %v5416_v60, %s5117_s20  ;;  %s5139_s19 = smov 79  }
  0x26   :  { %4196 = vmatmul.mubr.msk.f32.gmra.mrb[14].mxu0 %vm45_vm3, %v5293_v34  ;;  %4200 = vmatmul.mubr.msk.f32.gmra.mrb[14].mxu1 %vm45_vm3, %v5293_v34  ;;  %vm3810_vm3 = vcmask 797696  }
  0x27   :  { %4379 = vmatprep.mubr.msk.f32.mxu0 %vm5122_vm5, %v5108_v3  ;;  %4442 = vmatprep.mubr.msk.f32.mxu1 %vm5122_vm5, %v5108_v3 }
  0x29   :  { %928 = vrot.lane.b32.xlu1 %v5399_v58, %s5118_s21  ;;  %921 = vrot.lane.b32.xlu0 %v5399_v58, %s5119_s22  ;;  %s5133_s22 = smov 8  }
  0x8f   :  { %v773_v38 = vpop.permute.xlu0 %772 }
  0xdd   :  { %v131_v61 = vpop.f32.mrb[0].mxu0  ;;  %v208_v62 = vpop.f32.mrb[0].mxu1 }
  0xde   :  { %v133_v63 = vpop.f32.mrb[1].mxu0  ;;  %v210_v0 = vpop.f32.mrb[1].mxu1 }
  0xe1   :  { %v137_v1 = vpop.f32.mrb[2].mxu0  ;;  %v214_v2 = vpop.f32.mrb[2].mxu1 }
  0xe2   :  { %v139_v4 = vpop.f32.mrb[3].mxu0  ;;  %v216_v5 = vpop.f32.mrb[3].mxu1 }
  0xe5   :  { %v306_v6 = vpop.f32.mrb[4].mxu0  ;;  %v383_v7 = vpop.f32.mrb[4].mxu1 }
  0xe6   :  { %v394_v8 = vmax.f32 %v131_v61, %v306_v6  ;;  %v396_v9 = vmax.f32 %v208_v62, %v383_v7  ;;  %v308_v10 = vpop.f32.mrb[5].mxu0  ;;  %v385_v11 = vpop.f32.mrb[5].mxu1 }
  0xe7   :  { %v395_v12 = vmax.f32 %v133_v63, %v308_v10  ;;  %v397_v13 = vmax.f32 %v210_v0, %v385_v11  ;;  %v778_v61 = vpop.permute.xlu0 %777  ;;  %v840_v7 = vpop.permute.xlu1 %839 }
  0xe9   :  { %v312_v14 = vpop.f32.mrb[6].mxu0  ;;  %v389_v15 = vpop.f32.mrb[6].mxu1 }
  0xea   :  { %v398_v16 = vmax.f32 %v137_v1, %v312_v14  ;;  %v400_v17 = vmax.f32 %v214_v2, %v389_v15  ;;  %v314_v18 = vpop.f32.mrb[7].mxu0  ;;  %v391_v19 = vpop.f32.mrb[7].mxu1 }
  0xeb   :  { %v399_v20 = vmax.f32 %v139_v4, %v314_v18  ;;  %v401_v21 = vmax.f32 %v216_v5, %v391_v19  ;;  %v849_v14 = vpop.permute.xlu1 %848 }
  0xed   :  { %v489_v22 = vpop.f32.mrb[8].mxu0  ;;  %v566_v23 = vpop.f32.mrb[8].mxu1 }
  0xee   :  { %v577_v24 = vmax.f32 %v394_v8, %v489_v22  ;;  %v579_v25 = vmax.f32 %v396_v9, %v566_v23  ;;  %v491_v26 = vpop.f32.mrb[9].mxu0  ;;  %v568_v27 = vpop.f32.mrb[9].mxu1 }
  0xef   :  { %v578_v28 = vmax.f32 %v395_v12, %v491_v26  ;;  %v580_v29 = vmax.f32 %v397_v13, %v568_v27  ;;  %v826_v26 = vpop.permute.xlu0 %825 }
  0xf1   :  { %v495_v30 = vpop.f32.mrb[10].mxu0  ;;  %v572_v31 = vpop.f32.mrb[10].mxu1 }
  0xf2   :  { %v581_v32 = vmax.f32 %v398_v16, %v495_v30  ;;  %v583_v33 = vmax.f32 %v400_v17, %v572_v31  ;;  %v497_v34 = vpop.f32.mrb[11].mxu0  ;;  %v574_v35 = vpop.f32.mrb[11].mxu1  ;;  %v5121_v30 = vmov 0.0|0.0  }
  0xf3   :  { %v582_v36 = vmax.f32 %v399_v20, %v497_v34  ;;  %v584_v37 = vmax.f32 %v401_v21, %v574_v35  ;;  %4675 = vmatprep.subr.bf16.mxu0 %v5121_v30  ;;  %4702 = vmatprep.subr.bf16.mxu1 %v5121_v30 }
  0xf5   :  { %v672_v39 = vpop.f32.mrb[12].mxu0  ;;  %v749_v40 = vpop.f32.mrb[12].mxu1 }
  0xf6   :  { %v760_v41 = vmax.f32 %v577_v24, %v672_v39  ;;  %v762_v42 = vmax.f32 %v579_v25, %v749_v40  ;;  %v674_v43 = vpop.f32.mrb[13].mxu0  ;;  %v751_v44 = vpop.f32.mrb[13].mxu1 }
  0xf7   :  { %v761_v45 = vmax.f32 %v578_v28, %v674_v43  ;;  %v763_v46 = vmax.f32 %v580_v29, %v751_v44  ;;  %v863_v29 = vpop.permute.xlu1 %862 }
  0xf8   :  { %v780_v47 = vadd.f32 %v773_v38, %v760_v41  ;;  %v782_v48 = vadd.f32 %v773_v38, %v762_v42 }
  0xf9   :  { %v781_v49 = vadd.f32 %v773_v38, %v761_v45  ;;  %v783_v50 = vadd.f32 %v773_v38, %v763_v46  ;;  %v678_v51 = vpop.f32.mrb[14].mxu0  ;;  %v755_v52 = vpop.f32.mrb[14].mxu1 }
  0xfa   :  { %v5427_v53 = vmax.f32 %v780_v47, 0.0  ;;  %v5429_v54 = vmax.f32 %v782_v48, 0.0  ;;  %v764_v55 = vmax.f32 %v581_v32, %v678_v51  ;;  %v766_v56 = vmax.f32 %v583_v33, %v755_v52  ;;  %v680_v57 = vpop.f32.mrb[15].mxu0  ;;  %v757_v59 = vpop.f32.mrb[15].mxu1 }
  0xfb   :  { %v5431_v62 = vmax.f32 %v781_v49, 0.0  ;;  %v791_v63 = vmax.f32 %v783_v50, 0.0  ;;  %v765_v0 = vmax.f32 %v582_v36, %v680_v57  ;;  %v767_v1 = vmax.f32 %v584_v37, %v757_v59  ;;  %v879_v37 = vpop.permute.xlu0 %878  ;;  %v896_v43 = vpop.permute.xlu1 %895 }
  0xfc   :  { %v784_v2 = vadd.f32 %v778_v61, %v764_v55  ;;  %v786_v4 = vadd.f32 %v778_v61, %v766_v56  ;;  %v843_v13 = vmul.f32 %v840_v7, %v5429_v54  ;;  %v851_v19 = vmul.f32 %v849_v14, %v5429_v54 }
  0xfd   :  { %812 = vst.msk [vmem:[#allocation2 + $0x20] sm:$0xff] %vm801_vm4, %v791_v63  ;;  %v785_v5 = vadd.f32 %v778_v61, %v765_v0  ;;  %v787_v6 = vadd.f32 %v778_v61, %v767_v1  ;;  %v842_v12 = vmul.f32 %v840_v7, %v5431_v62  ;;  %v865_v31 = vmul.f32 %v863_v29, %v5431_v62 }
  0xfe   :  { %v5434_v8 = vmax.f32 %v784_v2, 0.0  ;;  %v5436_v9 = vmax.f32 %v786_v4, 0.0  ;;  %v866_v32 = vmul.f32 %v863_v29, %v5429_v54  ;;  %v828_v33 = vmul.f32 %v826_v26, %v5429_v54 }
  0xff   :  { %v5438_v10 = vmax.f32 %v785_v5, 0.0  ;;  %v795_v11 = vmax.f32 %v787_v6, 0.0  ;;  %v4967_v18 = vpack.i.bf16 %v843_v13, %v842_v12  ;;  %v881_v38 = vmul.f32 %v879_v37, %v5427_v53  ;;  %v910_v47 = vpop.permute.xlu0 %909  ;;  %v915_v55 = vpop.permute.xlu1 %914 }
 0x100   :  { %v845_v17 = vmul.f32 %v840_v7, %v5436_v9  ;;  %v853_v24 = vmul.f32 %v849_v14, %v5436_v9  ;;  %v829_v28 = vmul.f32 %v826_v26, %v5436_v9  ;;  %v868_v36 = vmul.f32 %v863_v29, %v5436_v9 }
 0x101   :  { %816 = vst.msk [vmem:[#allocation2 + $0x50] sm:$0xff] %vm801_vm4, %v795_v11  ;;  %v844_v16 = vmul.f32 %v840_v7, %v5438_v10  ;;  %4968 = vrot.lane.b32.xlu0 %v4967_v18, %s5120_s1  ;;  %v867_v35 = vmul.f32 %v863_v29, %v5438_v10  ;;  %v882_v39 = vmul.f32 %v879_v37, %v5431_v62  ;;  %v4213_v18 = vld [vmem:[%s6079_s5 + $0x6] ss:$0 sm:$0xff]  ;;  %vm3921_vm4 = vcmask 1043456  }
 0x102   :  { %v4987_v34 = vpack.i.bf16 %v829_v28, %v828_v33  ;;  %v4992_v40 = vpack.i.bf16 %v866_v32, %v865_v31  ;;  %v883_v41 = vmul.f32 %v879_v37, %v5434_v8  ;;  %v884_v42 = vmul.f32 %v879_v37, %v5438_v10 }
 0x103   :  { %v4977_v21 = vpack.i.bf16 %v845_v17, %v844_v16  ;;  %v898_v44 = vmul.f32 %v896_v43, %v5427_v53  ;;  %v899_v45 = vmul.f32 %v896_v43, %v5431_v62  ;;  %v5002_v46 = vpack.i.bf16 %v882_v39, %v881_v38  ;;  %v922_v61 = vpop.permute.xlu0 %921 }
 0x104   :  { %v5443_v15 = vld [vmem:[#allocation2 + $0x20] sm:$0xff]  ;;  %v900_v48 = vmul.f32 %v896_v43, %v5434_v8  ;;  %v901_v49 = vmul.f32 %v896_v43, %v5438_v10  ;;  %v5007_v50 = vpack.i.bf16 %v884_v42, %v883_v41  ;;  %v913_v51 = vmul.f32 %v910_v47, %v5434_v8 }
 0x105   :  { %v852_v20 = vmul.f32 %v849_v14, %v5443_v15  ;;  %4978 = vrot.lane.b32.xlu1 %v4977_v21, %s5120_s1  ;;  %v5012_v52 = vpack.i.bf16 %v899_v45, %v898_v44  ;;  %v918_v56 = vmul.f32 %v915_v55, %v5443_v15  ;;  %v912_v57 = vmul.f32 %v910_v47, %v5427_v53 }
 0x106   :  { %v5017_v59 = vpack.i.bf16 %v901_v49, %v900_v48  ;;  %v917_v63 = vmul.f32 %v915_v55, %v5429_v54  ;;  %v919_v2 = vmul.f32 %v915_v55, %v5436_v9  ;;  %v924_v4 = vmul.f32 %v922_v61, %v5431_v62 }
 0x107   :  { %v4972_v22 = vpack.i.bf16 %v852_v20, %v851_v19  ;;  %v5022_v1 = vpack.i.bf16 %v913_v51, %v912_v57  ;;  %v925_v5 = vmul.f32 %v922_v61, %v5429_v54  ;;  %v926_v7 = vmul.f32 %v922_v61, %v5438_v10  ;;  %v5522_v57 = vld [vmem:[%s6080_s3] sm:$0xf] }
 0x108   :  { %v5449_v23 = vld [vmem:[#allocation2 + $0x50] sm:$0xff]  ;;  %v5027_v6 = vpack.i.bf16 %v918_v56, %v917_v63  ;;  %v927_v11 = vmul.f32 %v922_v61, %v5436_v9  ;;  %v4217_v56 = vld [vmem:[%s6079_s5 + $0x8] ss:$0 sm:$0xff] }
 0x109   :  { %v854_v25 = vmul.f32 %v849_v14, %v5449_v23  ;;  %4973 = vrot.lane.b32.xlu0 %v4972_v22, %s5115_s16  ;;  %v920_v0 = vmul.f32 %v915_v55, %v5449_v23  ;;  %v5032_v13 = vpack.i.bf16 %v925_v5, %v924_v4  ;;  %v929_v14 = vpop.permute.xlu1 %928 }
 0x10a   :  { %v932_v16 = vmul.f32 %v929_v14, %v5443_v15  ;;  %v5042_v17 = vpack.i.bf16 %v927_v11, %v926_v7  ;;  %v931_v19 = vmul.f32 %v929_v14, %v5429_v54  ;;  %v934_v20 = vmul.f32 %v929_v14, %v5449_v23 }
 0x10b   :  { %v4982_v27 = vpack.i.bf16 %v854_v25, %v853_v24  ;;  %v5037_v12 = vpack.i.bf16 %v920_v0, %v919_v2  ;;  %v933_v21 = vmul.f32 %v929_v14, %v5436_v9  ;;  %v4215_v24 = vld [vmem:[%s6079_s5 + $0x7] ss:$0 sm:$0xff] }
 0x10c   :  { %v5047_v22 = vpack.i.bf16 %v932_v16, %v931_v19 }
 0x10d   :  { %4983 = vrot.lane.b32.xlu1 %v4982_v27, %s5115_s16  ;;  %935 = vrot.lane.b32.xlu0 %v5416_v60, %s5123_s23  ;;  %v4997_v60 = vpack.i.bf16 %v868_v36, %v867_v35  ;;  %v5052_v15 = vpack.i.bf16 %v934_v20, %v933_v21 }
 0x111   :  { %4988 = vrot.lane.b32.xlu1 %v4987_v34, %s5114_s15  ;;  %4993 = vrot.lane.b32.xlu0 %v4992_v40, %s5124_s24  ;;  %v5504_v40 = vld [vmem:[%s6080_s3 + $0x4] sm:$0xf] }
 0x115   :  { %4998 = vrot.lane.b32.xlu1 %v4997_v60, %s5124_s24  ;;  %5003 = vrot.lane.b32.xlu0 %v5002_v46, %s5111_s26 }
 0x119   :  { %5008 = vrot.lane.b32.xlu1 %v5007_v50, %s5111_s26  ;;  %5013 = vrot.lane.b32.xlu0 %v5012_v52, %s5113_s30  ;;  %s5126_s26 = smov 91  }
 0x11d   :  { %5018 = vrot.lane.b32.xlu1 %v5017_v59, %s5113_s30  ;;  %5023 = vrot.lane.b32.xlu0 %v5022_v1, %s5125_s25  ;;  %s5134_s25 = smov 24  }
 0x121   :  { %5028 = vrot.lane.b32.xlu1 %v5027_v6, %s5126_s26  ;;  %5038 = vrot.lane.b32.xlu0 %v5037_v12, %s5126_s26 }
 0x125   :  { %5033 = vrot.lane.b32.xlu1 %v5032_v13, %s5127_s0  ;;  %5043 = vrot.lane.b32.xlu0 %v5042_v17, %s5127_s0 }
 0x129   :  { %949 = vrot.lane.b32.xlu1 %v4213_v18, %s5128_s28  ;;  %5048 = vrot.lane.b32.xlu0 %v5047_v22, %s5129_s29  ;;  %v5538_v18 = vld [vmem:[%s6080_s3 + $0x8] sm:$0xf] }
 0x12d   :  { %5053 = vrot.lane.b32.xlu1 %v5052_v15, %s5129_s29  ;;  %963 = vrot.lane.b32.xlu0 %v4215_v24, %s5130_s12  ;;  %v894_v15 = vmul.f32 %v5399_v58, %v5434_v8 }
 0x131   :  { %968 = vrot.lane.b32.xlu1 %v4215_v24, %s5131_s13 }
 0x173   :  { %v4969_v25 = vpop.permute.xlu0 %4968 }
 0x174   :  { %v4971_v23 = vunpack.i.h.bf16 %v4969_v25  ;;  %v4970_v26 = vunpack.i.l.bf16 %v4969_v25  ;;  %v893_v25 = vmul.f32 %v5399_v58, %v5427_v53 }
 0x176   :  { %v1003_v31 = vsel %vm1002_vm6, %v4970_v26, %v4971_v23  ;;  %v5565_v26 = vpack.c.bf16 %v894_v15, %v893_v25  ;;  %v5669_v25 = vld [vmem:[#allocation2] sm:$0xff] }
 0x177   :  { %v4979_v27 = vpop.permute.xlu1 %4978 }
 0x178   :  { %v4981_v28 = vunpack.i.h.bf16 %v4979_v27  ;;  %v4980_v29 = vunpack.i.l.bf16 %v4979_v27  ;;  %v5570_v27 = vld [vmem:[%s6080_s3 + $0xc] sm:$0xf] }
 0x17a   :  { %v1004_v33 = vsel %vm1002_vm6, %v4980_v29, %v4981_v28  ;;  %vm3830_vm6 = vcmask 801792  }
 0x17b   :  { %v4974_v32 = vpop.permute.xlu0 %4973  ;;  %v4676_v34 = vpack.c.bf16 %v1004_v33, %v1003_v31 }
 0x17c   :  { %v4976_v35 = vunpack.i.h.bf16 %v4974_v32  ;;  %v4975_v36 = vunpack.i.l.bf16 %v4974_v32 }
 0x17d   :  { %4677 = vmatpush3.bf16.msra.mxu0 %v4676_v34 }
 0x17e   :  { %4678 = vmatprep.subr.bf16.mxu0 %v5121_v30  ;;  %v1177_v45 = vsel %vm1176_vm7, %v4975_v36, %v4976_v35 }
 0x17f   :  { %v4984_v37 = vpop.permute.xlu1 %4983  ;;  %v936_v41 = vpop.permute.xlu0 %935 }
 0x180   :  { %v4986_v38 = vunpack.i.h.bf16 %v4984_v37  ;;  %v4985_v39 = vunpack.i.l.bf16 %v4984_v37  ;;  %v938_v42 = vmul.f32 %v936_v41, %v5431_v62  ;;  %v939_v60 = vmul.f32 %v936_v41, %v5429_v54  ;;  %4380 = vmatmul.mubr.msk.f32.vlgmr.msra.gmra.mrb[16].mxu0 %vm1007_vm8, %v5504_v40 }
 0x181   :  { %v940_v43 = vmul.f32 %v936_v41, %v5438_v10  ;;  %v941_v44 = vmul.f32 %v936_v41, %v5436_v9  ;;  %4386 = vmatprep.mubr.msk.f32.mxu0 %vm5122_vm5, %v5108_v3 }
 0x182   :  { %v1178_v46 = vsel %vm1176_vm7, %v4985_v39, %v4986_v38  ;;  %v5057_v51 = vpack.i.bf16 %v939_v60, %v938_v42  ;;  %vm3832_vm7 = vcmask 154624  }
 0x183   :  { %v4989_v47 = vpop.permute.xlu1 %4988  ;;  %v4682_v48 = vpack.c.bf16 %v1178_v46, %v1177_v45  ;;  %v4994_v52 = vpop.permute.xlu0 %4993  ;;  %v5062_v55 = vpack.i.bf16 %v941_v44, %v940_v43  ;;  %v5599_v45 = vld [vmem:[%s6080_s3 + $0x10] sm:$0xf] }
 0x184   :  { %v4991_v49 = vunpack.i.h.bf16 %v4989_v47  ;;  %v4990_v50 = vunpack.i.l.bf16 %v4989_v47  ;;  %5058 = vrot.lane.b32.xlu0 %v5057_v51, %s5132_s17  ;;  %v4996_v0 = vunpack.i.h.bf16 %v4994_v52  ;;  %v4995_v1 = vunpack.i.l.bf16 %v4994_v52 }
 0x185   :  { %4704 = vmatpush3.bf16.msra.mxu1 %v4682_v48  ;;  %5063 = vrot.lane.b32.xlu1 %v5062_v55, %s5132_s17 }
 0x186   :  { %v4679_v54 = vpack.c.bf16 %v4991_v49, %v4990_v50  ;;  %4705 = vmatprep.subr.bf16.mxu1 %v5121_v30  ;;  %v1949_v13 = vsel %vm1948_vm9, %v4995_v1, %v4996_v0 }
 0x187   :  { %v4999_v9 = vpop.permute.xlu1 %4998  ;;  %v5004_v59 = vpop.permute.xlu0 %5003 }
 0x188   :  { %4680 = vmatpush3.bf16.msra.mxu0 %v4679_v54  ;;  %v5001_v61 = vunpack.i.h.bf16 %v4999_v9  ;;  %v5000_v63 = vunpack.i.l.bf16 %v4999_v9  ;;  %4443 = vmatmul.mubr.msk.f32.vlgmr.msra.gmra.mrb[16].mxu1 %vm1007_vm8, %v5504_v40  ;;  %v5006_v6 = vunpack.i.h.bf16 %v5004_v59  ;;  %v5005_v7 = vunpack.i.l.bf16 %v5004_v59 }
 0x189   :  { %4681 = vmatprep.subr.bf16.mxu0 %v5121_v30  ;;  %982 = vrot.lane.b32.xlu0 %v4217_v56, %s5133_s22 }
 0x18a   :  { %4707 = vmatpush3.bf16.msra.mxu1 %v4676_v34  ;;  %4449 = vmatprep.mubr.msk.f32.mxu1 %vm5122_vm5, %v5108_v3  ;;  %v1950_v11 = vsel %vm1948_vm9, %v5000_v63, %v5001_v61  ;;  %v1270_v19 = vsel %vm1269_vm10, %v5005_v7, %v5006_v6  ;;  %vm4119_vm9 = vcmask 91216  }
 0x18b   :  { %v5009_v2 = vpop.permute.xlu1 %5008  ;;  %4387 = vmatmul.mubr.msk.f32.vlgmr.msra.gmra.mrb[16].mxu0 %vm1007_vm8, %v5522_v57  ;;  %4708 = vmatprep.subr.bf16.mxu1 %v5121_v30  ;;  %v5014_v12 = vpop.permute.xlu0 %5013  ;;  %v4709_v17 = vpack.c.bf16 %v1950_v11, %v1949_v13 }
 0x18c   :  { %v5011_v4 = vunpack.i.h.bf16 %v5009_v2  ;;  %v5010_v5 = vunpack.i.l.bf16 %v5009_v2  ;;  %4683 = vmatpush3.bf16.msra.mxu0 %v4682_v48  ;;  %4393 = vmatprep.mubr.msk.f32.mxu0 %vm5122_vm5, %v5108_v3  ;;  %v5016_v58 = vunpack.i.h.bf16 %v5014_v12  ;;  %v5015_v32 = vunpack.i.l.bf16 %v5014_v12 }
 0x18d   :  { %4684 = vmatprep.subr.bf16.mxu0 %v5121_v30 }
 0x18e   :  { %v1271_v14 = vsel %vm1269_vm10, %v5010_v5, %v5011_v4  ;;  %v1439_v42 = vsel %vm1438_vm11, %v5015_v32, %v5016_v58  ;;  %vm4106_vm10 = vcmask 74752  }
 0x18f   :  { %v5019_v16 = vpop.permute.xlu1 %5018  ;;  %v5540_v20 = vpop.permute.xlu0 %5023  ;;  %v5544_v21 = vpack.c.bf16 %v1271_v14, %v1270_v19  ;;  %v5654_v19 = vld [vmem:[%s6080_s3 + $0x18] sm:$0xf] }
 0x190   :  { %4450 = vmatmul.mubr.msk.f32.vlgmr.msra.gmra.mrb[16].mxu1 %vm1007_vm8, %v5522_v57  ;;  %v5021_v28 = vunpack.i.h.bf16 %v5019_v16  ;;  %v5020_v29 = vunpack.i.l.bf16 %v5019_v16  ;;  %v5026_v47 = vunpack.i.h.bf16 %v5540_v20  ;;  %v5025_v48 = vunpack.i.l.bf16 %v5540_v20 }
 0x191   :  { %4710 = vmatpush3.bf16.msra.mxu1 %v4709_v17  ;;  %4456 = vmatprep.mubr.msk.f32.mxu1 %vm5122_vm5, %v5108_v3 }
 0x192   :  { %4711 = vmatprep.subr.bf16.mxu1 %v5121_v30  ;;  %v1440_v37 = vsel %vm1438_vm11, %v5020_v29, %v5021_v28  ;;  %v5679_v29 = vld [vmem:[%s6080_s3 + $0x1c] sm:$0xf]  ;;  %vm4130_vm11 = vcmask 9216  }
 0x193   :  { %v5548_v22 = vpop.permute.xlu1 %5028  ;;  %4394 = vmatmul.mubr.msk.f32.vlgmr.msra.gmra.mrb[16].mxu0 %vm1007_vm8, %v5538_v18  ;;  %v5558_v24 = vpop.permute.xlu0 %5038  ;;  %v5594_v44 = vpack.c.bf16 %v1440_v37, %v1439_v42 }
 0x194   :  { %4686 = vmatpush3.bf16.msra.mxu0 %v5544_v21  ;;  %4400 = vmatprep.mubr.msk.f32.mxu0 %vm5122_vm5, %v5108_v3  ;;  %v5041_v51 = vunpack.i.h.bf16 %v5558_v24  ;;  %v5040_v52 = vunpack.i.l.bf16 %v5558_v24  ;;  %v5031_v55 = vunpack.i.h.bf16 %v5548_v22  ;;  %v5030_v54 = vunpack.i.l.bf16 %v5548_v22 }
 0x195   :  { %4687 = vmatprep.subr.bf16.mxu0 %v5121_v30 }
 0x196   :  { %v1533_v2 = vsel %vm1531_vm12, %v5040_v52, %v5041_v51  ;;  %v1532_v4 = vsel %vm1531_vm12, %v5030_v54, %v5031_v55  ;;  %vm4137_vm12 = vcmask 80896  }
 0x197   :  { %v5563_v23 = vpop.permute.xlu1 %5033  ;;  %v5572_v31 = vpop.permute.xlu0 %5043  ;;  %v4694_v13 = vpack.c.bf16 %v1533_v2, %v1532_v4 }
 0x198   :  { %4457 = vmatmul.mubr.msk.f32.vlgmr.msra.gmra.mrb[16].mxu1 %vm1007_vm8, %v5538_v18  ;;  %v5046_v6 = vunpack.i.h.bf16 %v5572_v31  ;;  %v5045_v7 = vunpack.i.l.bf16 %v5572_v31  ;;  %v5036_v11 = vunpack.i.h.bf16 %v5563_v23  ;;  %v5035_v12 = vunpack.i.l.bf16 %v5563_v23  ;;  %v5696_v31 = vld [vmem:[%s6080_s3 + $0x20] sm:$0xf] }
 0x199   :  { %4713 = vmatpush3.bf16.msra.mxu1 %v5565_v26  ;;  %4463 = vmatprep.mubr.msk.f32.mxu1 %vm5122_vm5, %v5108_v3 }
 0x19a   :  { %4714 = vmatprep.subr.bf16.mxu1 %v5121_v30  ;;  %v1626_v14 = vsel %vm1624_vm13, %v5045_v7, %v5046_v6  ;;  %v1625_v16 = vsel %vm1624_vm13, %v5035_v12, %v5036_v11  ;;  %v3856_v7 = vld [vmem:[%s6082_s6 + $0x8] sm:$0xff]  ;;  %v3858_v11 = vld [vmem:[%s6082_s6 + $0x18] sm:$0xff]  ;;  %v3855_v12 = vld [vmem:[%s6082_s6] sm:$0xff]  ;;  %vm4139_vm13 = vcmask 91136  }
 0x19b   :  { %v950_v33 = vpop.permute.xlu1 %949  ;;  %4401 = vmatmul.mubr.msk.f32.vlgmr.msra.gmra.mrb[16].mxu0 %vm1007_vm8, %v5570_v27  ;;  %v5586_v38 = vpop.permute.xlu0 %5048  ;;  %v5649_v17 = vpack.c.bf16 %v1626_v14, %v1625_v16  ;;  %v3857_v14 = vld [vmem:[%s6082_s6 + $0x10] sm:$0xff]  ;;  %v3860_v16 = vld [vmem:[%s6082_s6 + $0x28] sm:$0xff] }
 0x19c   :  { %v952_v34 = vmul.f32 %v950_v33, %v5427_v53  ;;  %v953_v35 = vmul.f32 %v950_v33, %v5431_v62  ;;  %v954_v36 = vmul.f32 %v950_v33, %v5434_v8  ;;  %4689 = vmatpush3.bf16.msra.mxu0 %v5565_v26  ;;  %v955_v39 = vmul.f32 %v950_v33, %v5438_v10 }
 0x19d   :  { %4407 = vmatprep.mubr.msk.f32.mxu0 %vm5122_vm5, %v5108_v3  ;;  %4690 = vmatprep.subr.bf16.mxu0 %v5121_v30  ;;  %v5051_v15 = vunpack.i.h.bf16 %v5586_v38  ;;  %v5050_v24 = vunpack.i.l.bf16 %v5586_v38 }
 0x19e   :  { %v5067_v41 = vpack.i.bf16 %v953_v35, %v952_v34  ;;  %v5072_v43 = vpack.i.bf16 %v955_v39, %v954_v36 }
 0x19f   :  { %v5592_v60 = vpop.permute.xlu1 %5053  ;;  %v964_v46 = vpop.permute.xlu0 %963 }
 0x1a0   :  { %5068 = vrot.lane.b32.xlu1 %v5067_v41, %s5134_s25  ;;  %5073 = vrot.lane.b32.xlu0 %v5072_v43, %s5134_s25  ;;  %v966_v49 = vmul.f32 %v964_v46, %v5427_v53  ;;  %v967_v50 = vmul.f32 %v964_v46, %v5434_v8  ;;  %v5056_v20 = vunpack.i.h.bf16 %v5592_v60  ;;  %v5055_v22 = vunpack.i.l.bf16 %v5592_v60 }
 0x1a1   :  { %4464 = vmatmul.mubr.msk.f32.vlgmr.msra.gmra.mrb[16].mxu1 %vm1007_vm8, %v5570_v27 }
 0x1a2   :  { %4716 = vmatpush3.bf16.msra.mxu1 %v5594_v44  ;;  %4470 = vmatprep.mubr.msk.f32.mxu1 %vm5122_vm5, %v5108_v3  ;;  %v5077_v56 = vpack.i.bf16 %v967_v50, %v966_v49  ;;  %v1719_v23 = vsel %vm1717_vm14, %v5055_v22, %v5056_v20  ;;  %v3802_v49 = vld [vmem:[%s6081_s4] sm:$0xf]  ;;  %s5138_s4 = smov 49  }
 0x1a3   :  { %v969_v9 = vpop.permute.xlu1 %968  ;;  %4408 = vmatmul.mubr.msk.f32.vlgmr.msra.gmra.mrb[16].mxu0 %vm1007_vm8, %v5599_v45  ;;  %4717 = vmatprep.subr.bf16.mxu1 %v5121_v30  ;;  %v3859_v22 = vld [vmem:[%s6082_s6 + $0x20] sm:$0xff] }
 0x1a4   :  { %v971_v59 = vmul.f32 %v969_v9, %v5427_v53  ;;  %v972_v61 = vmul.f32 %v969_v9, %v5431_v62  ;;  %v973_v63 = vmul.f32 %v969_v9, %v5434_v8  ;;  %4692 = vmatpush3.bf16.msra.mxu0 %v5594_v44  ;;  %v974_v0 = vmul.f32 %v969_v9, %v5438_v10  ;;  %v5632_v10 = vld [vmem:[%s6080_s3 + $0x14] sm:$0xf]  ;;  %s5137_s3 = smov 120  }
 0x1a5   :  { %4414 = vmatprep.mubr.msk.f32.mxu0 %vm5122_vm5, %v5108_v3  ;;  %4693 = vmatprep.subr.bf16.mxu0 %v5121_v30  ;;  %v5627_v62 = vpack.c.bf16 %v5026_v47, %v5025_v48 }
 0x1a6   :  { %5078 = vrot.lane.b32.xlu1 %v5077_v56, %s5135_s2  ;;  %v5082_v1 = vpack.i.bf16 %v972_v61, %v971_v59  ;;  %v5087_v5 = vpack.i.bf16 %v974_v0, %v973_v63 }
 0x1a8   :  { %5083 = vrot.lane.b32.xlu0 %v5082_v1, %s5136_s27 }
 0x1a9   :  { %4471 = vmatmul.mubr.msk.f32.vlgmr.msra.gmra.mrb[16].mxu1 %vm1007_vm8, %v5599_v45 }
 0x1aa   :  { %5088 = vrot.lane.b32.xlu1 %v5087_v5, %s5136_s27  ;;  %4719 = vmatpush3.bf16.msra.mxu1 %v5627_v62  ;;  %s5140_s27 = smov 19  }
 0x1ab   :  { %4415 = vmatmul.mubr.msk.f32.vlgmr.msra.gmra.mrb[16].mxu0 %vm1007_vm8, %v5632_v10  ;;  %4477 = vmatprep.mubr.msk.f32.mxu1 %vm5122_vm5, %v5108_v3 }
 0x1ac   :  { %4695 = vmatpush3.bf16.msra.mxu0 %v4694_v13  ;;  %4720 = vmatprep.subr.bf16.mxu1 %v5121_v30 }
 0x1ad   :  { %4421 = vmatprep.mubr.msk.f32.mxu0 %vm5122_vm5, %v5108_v3  ;;  %4696 = vmatprep.subr.bf16.mxu0 %v5121_v30 }
 0x1ae   :  { %3805 = vperm.xlu1 %5097, %v3802_v49   ;;  %v3884_v49 = vld [vmem:[%s6082_s6 + $0xe8] sm:$0xff] }
 0x1b1   :  { %4478 = vmatmul.mubr.msk.f32.vlgmr.msra.gmra.mrb[16].mxu1 %vm1007_vm8, %v5632_v10 }
 0x1b2   :  { %4722 = vmatpush3.bf16.msra.mxu1 %v5649_v17  ;;  %4484 = vmatprep.mubr.msk.f32.mxu1 %vm5122_vm5, %v5108_v3  ;;  %v1718_v3 = vsel %vm1717_vm14, %v5050_v24, %v5051_v15  ;;  %v3861_v15 = vld [vmem:[%s6082_s6 + $0x30] sm:$0xff]  ;;  %v3864_v24 = vld [vmem:[%s6082_s6 + $0x48] sm:$0xff] }
 0x1b3   :  { %4422 = vmatmul.mubr.msk.f32.vlgmr.msra.gmra.mrb[16].mxu0 %vm1007_vm8, %v5654_v19  ;;  %4723 = vmatprep.subr.bf16.mxu1 %v5121_v30  ;;  %v5674_v28 = vpack.c.bf16 %v1719_v23, %v1718_v3  ;;  %v4789_v23 = vpack.c.bf16 %v3861_v15, %v3859_v22  ;;  %v3897_v15 = vld [vmem:[%s6082_s6 + $0x150] sm:$0xff] }
 0x1b4   :  { %4698 = vmatpush3.bf16.msra.mxu0 %v5649_v17  ;;  %4428 = vmatprep.mubr.msk.f32.mxu0 %vm5122_vm5, %v5669_v25 }
 0x1b5   :  { %4699 = vmatprep.subr.bf16.mxu0 %v5121_v30 }
 0x1b9   :  { %4485 = vmatmul.mubr.msk.f32.vlgmr.msra.gmra.mrb[16].mxu1 %vm1007_vm8, %v5654_v19 }
 0x1ba   :  { %4725 = vmatpush3.bf16.msra.mxu1 %v5674_v28  ;;  %4491 = vmatprep.mubr.msk.f32.mxu1 %vm5122_vm5, %v5669_v25 }
 0x1bb   :  { %4429 = vmatmul.mubr.msk.f32.vlgmr.msra.gmra.mrb[16].mxu0 %vm1007_vm8, %v5679_v29  ;;  %4726 = vmatprep.subr.bf16.mxu1 %v5121_v30 }
 0x1bc   :  { %4701 = vmatpush3.bf16.msra.mxu0 %v5674_v28  ;;  %4435 = vmatprep.mubr.msk.f32.mxu0 %vm5122_vm5, %v5669_v25 }
 0x1bd   :  { %4729 = vmatprep.subr.bf16.mxu0 %v5121_v30 }
 0x1c1   :  { %4492 = vmatmul.mubr.msk.f32.vlgmr.msra.gmra.mrb[16].mxu1 %vm1007_vm8, %v5679_v29 }
 0x1c2   :  { %4498 = vmatprep.mubr.msk.f32.mxu1 %vm5122_vm5, %v5669_v25 }
 0x1c3   :  { %4436 = vmatmul.mubr.msk.f32.vlgmr.msra.gmra.mrb[16].mxu0 %vm1007_vm8, %v5696_v31 }
 0x1c4   :  { %4731 = vmatpush3.bf16.msra.mxu0 %v5565_v26  ;;  %4505 = vmatprep.mubr.msk.f32.mxu0 %vm5122_vm5, %v5669_v25 }
 0x1c5   :  { %4732 = vmatprep.subr.bf16.mxu0 %v5121_v30 }
 0x1c7   :  { %4506 = vmatmul.mubr.msk.f32.vlgmr.msra.gmra.mrb[18].mxu0 %vm1007_vm8, %v5504_v40 }
 0x1c8   :  { %4734 = vmatpush3.bf16.msra.mxu0 %v5544_v21  ;;  %4512 = vmatprep.mubr.msk.f32.mxu0 %vm5122_vm5, %v5669_v25 }
 0x1c9   :  { %4735 = vmatprep.subr.bf16.mxu0 %v5121_v30 }
 0x1cf   :  { %4513 = vmatmul.mubr.msk.f32.vlgmr.msra.gmra.mrb[18].mxu0 %vm1007_vm8, %v5522_v57 }
 0x1d0   :  { %4737 = vmatpush3.bf16.msra.mxu0 %v5594_v44  ;;  %4519 = vmatprep.mubr.msk.f32.mxu0 %vm5122_vm5, %v5669_v25 }
 0x1d1   :  { %4738 = vmatprep.subr.bf16.mxu0 %v5121_v30 }
 0x1d7   :  { %4520 = vmatmul.mubr.msk.f32.vlgmr.msra.gmra.mrb[18].mxu0 %vm1007_vm8, %v5538_v18 }
 0x1d8   :  { %4740 = vmatpush3.bf16.msra.mxu0 %v4694_v13  ;;  %4526 = vmatprep.mubr.msk.f32.mxu0 %vm5122_vm5, %v5669_v25  ;;  %v4783_v13 = vpack.c.bf16 %v3858_v11, %v3856_v7 }
 0x1d9   :  { %4741 = vmatprep.subr.bf16.mxu0 %v5121_v30 }
 0x1df   :  { %4527 = vmatmul.mubr.msk.f32.vlgmr.msra.gmra.mrb[18].mxu0 %vm1007_vm8, %v5570_v27 }
 0x1e0   :  { %4743 = vmatpush3.bf16.msra.mxu0 %v5649_v17  ;;  %4533 = vmatprep.mubr.msk.f32.mxu0 %vm5122_vm5, %v5669_v25 }
 0x1e1   :  { %4744 = vmatprep.subr.bf16.mxu0 %v5121_v30 }
 0x1e7   :  { %4534 = vmatmul.mubr.msk.f32.vlgmr.msra.gmra.mrb[18].mxu0 %vm1007_vm8, %v5599_v45 }
 0x1e8   :  { %4746 = vmatpush3.bf16.msra.mxu0 %v5674_v28  ;;  %4540 = vmatprep.mubr.msk.f32.mxu0 %vm5122_vm5, %v5669_v25 }
 0x1e9   :  { %4747 = vmatprep.subr.bf16.mxu0 %v5121_v30 }
 0x1ef   :  { %4541 = vmatmul.mubr.msk.f32.vlgmr.msra.gmra.mrb[18].mxu0 %vm1007_vm8, %v5632_v10 }
 0x1f0   :  { %4547 = vmatprep.mubr.msk.f32.mxu0 %vm5122_vm5, %v5669_v25 }
 0x1f6   :  { %v5059_v21 = vpop.permute.xlu0 %5058 }
 0x1f7   :  { %v5061_v58 = vunpack.i.h.bf16 %v5059_v21  ;;  %v5060_v32 = vunpack.i.l.bf16 %v5059_v21  ;;  %v5064_v33 = vpop.permute.xlu1 %5063  ;;  %v3870_v21 = vld [vmem:[%s6082_s6 + $0x78] sm:$0xff] }
 0x1f8   :  { %v5066_v34 = vunpack.i.h.bf16 %v5064_v33  ;;  %v5065_v35 = vunpack.i.l.bf16 %v5064_v33  ;;  %v3867_v33 = vld [vmem:[%s6082_s6 + $0x60] sm:$0xff] }
 0x1f9   :  { %v2400_v36 = vsel %vm2399_vm15, %v5060_v32, %v5061_v58 }
 0x1fa   :  { %v2401_v37 = vsel %vm2399_vm15, %v5065_v35, %v5066_v34  ;;  %v3869_v34 = vld [vmem:[%s6082_s6 + $0x70] sm:$0xff]  ;;  %v3872_v35 = vld [vmem:[%s6082_s6 + $0x88] sm:$0xff] }
 0x1fb   :  { %v983_v38 = vpop.permute.xlu0 %982  ;;  %v5741_v39 = vpack.c.bf16 %v2401_v37, %v2400_v36  ;;  %v3874_v36 = vld [vmem:[%s6082_s6 + $0x98] sm:$0xff]  ;;  %v4797_v37 = vpack.c.bf16 %v3869_v34, %v3867_v33  ;;  %v4001_v34 = vld [vmem:[%s6083_s8] sm:$0xff] }
 0x1fc   :  { %v985_v41 = vmul.f32 %v983_v38, %v5427_v53  ;;  %v986_v42 = vmul.f32 %v983_v38, %v5434_v8  ;;  %v4799_v38 = vpack.c.bf16 %v3874_v36, %v3872_v35  ;;  %v4002_v35 = vld [vmem:[%s6083_s8 + $0x8] sm:$0xff] }
 0x1fd   :  { %4728 = vmatpush3.bf16.msra.mxu1 %v5741_v39  ;;  %v4832_v36 = vpack.c.bf16 %v4002_v35, %v4001_v34 }
 0x1fe   :  { %v5092_v60 = vpack.i.bf16 %v986_v42, %v985_v41  ;;  %4756 = vmatprep.subr.bf16.mxu1 %v5121_v30  ;;  %v3873_v41 = vld [vmem:[%s6082_s6 + $0x90] sm:$0xff]  ;;  %v3876_v42 = vld [vmem:[%s6082_s6 + $0xa8] sm:$0xff] }
 0x200   :  { %5093 = vrot.lane.b32.xlu0 %v5092_v60, %s5137_s3  ;;  %4499 = vmatmul.mubr.msk.f32.vlgmr.msra.gmra.mrb[16].mxu1 %vm1007_vm8, %v5696_v31  ;;  %v3878_v60 = vld [vmem:[%s6082_s6 + $0xb8] sm:$0xff] }
 0x201   :  { %4758 = vmatpush3.bf16.msra.mxu1 %v5594_v44  ;;  %4568 = vmatprep.mubr.msk.f32.mxu1 %vm5122_vm5, %v5669_v25 }
 0x202   :  { %4759 = vmatprep.subr.bf16.mxu1 %v5121_v30 }
 0x204   :  { %4569 = vmatmul.mubr.msk.f32.vlgmr.msra.gmra.mrb[18].mxu1 %vm1007_vm8, %v5504_v40 }
 0x205   :  { %4761 = vmatpush3.bf16.msra.mxu1 %v5565_v26  ;;  %4575 = vmatprep.mubr.msk.f32.mxu1 %vm5122_vm5, %v5669_v25 }
 0x206   :  { %4762 = vmatprep.subr.bf16.mxu1 %v5121_v30 }
 0x20c   :  { %4576 = vmatmul.mubr.msk.f32.vlgmr.msra.gmra.mrb[18].mxu1 %vm1007_vm8, %v5522_v57 }
 0x20d   :  { %4764 = vmatpush3.bf16.msra.mxu1 %v5627_v62  ;;  %4582 = vmatprep.mubr.msk.f32.mxu1 %vm5122_vm5, %v5669_v25 }
 0x20e   :  { %4765 = vmatprep.subr.bf16.mxu1 %v5121_v30 }
 0x212   :  { %v5069_v53 = vpop.permute.xlu1 %5068  ;;  %v5074_v8 = vpop.permute.xlu0 %5073 }
 0x213   :  { %v5071_v40 = vunpack.i.h.bf16 %v5069_v53  ;;  %v5070_v26 = vunpack.i.l.bf16 %v5069_v53  ;;  %v5076_v43 = vunpack.i.h.bf16 %v5074_v8  ;;  %v5075_v44 = vunpack.i.l.bf16 %v5074_v8 }
 0x214   :  { %4583 = vmatmul.mubr.msk.f32.vlgmr.msra.gmra.mrb[18].mxu1 %vm1007_vm8, %v5538_v18  ;;  %v4803_v8 = vpack.c.bf16 %v3878_v60, %v3876_v42  ;;  %v4005_v60 = vld [vmem:[%s6083_s8 + $0x20] sm:$0xff] }
 0x215   :  { %v2913_v46 = vsel %vm2912_vm1, %v5070_v26, %v5071_v40  ;;  %v2914_v47 = vsel %vm2912_vm1, %v5075_v44, %v5076_v43  ;;  %4767 = vmatpush3.bf16.msra.mxu1 %v5649_v17  ;;  %4589 = vmatprep.mubr.msk.f32.mxu1 %vm5122_vm5, %v5669_v25  ;;  %v3862_v17 = vld [vmem:[%s6082_s6 + $0x38] sm:$0xff]  ;;  %v3875_v40 = vld [vmem:[%s6082_s6 + $0xa0] sm:$0xff]  ;;  %v3877_v26 = vld [vmem:[%s6082_s6 + $0xb0] sm:$0xff] }
 0x216   :  { %v4748_v57 = vpack.c.bf16 %v2914_v47, %v2913_v46  ;;  %4768 = vmatprep.subr.bf16.mxu1 %v5121_v30  ;;  %v4787_v20 = vpack.c.bf16 %v3862_v17, %v3860_v16  ;;  %v3880_v43 = vld [vmem:[%s6082_s6 + $0xc8] sm:$0xff]  ;;  %v3882_v44 = vld [vmem:[%s6082_s6 + $0xd8] sm:$0xff]  ;;  %v4805_v46 = vpack.c.bf16 %v3877_v26, %v3875_v40  ;;  %v4007_v40 = vld [vmem:[%s6083_s8 + $0x30] sm:$0xff] }
 0x217   :  { %v4807_v47 = vpack.c.bf16 %v3882_v44, %v3880_v43  ;;  %v3896_v16 = vld [vmem:[%s6082_s6 + $0x148] sm:$0xff]  ;;  %v3898_v17 = vld [vmem:[%s6082_s6 + $0x158] sm:$0xff]  ;;  %v4009_v44 = vld [vmem:[%s6083_s8 + $0x40] sm:$0xff] }
 0x218   :  { %v5079_v48 = vpop.permute.xlu1 %5078  ;;  %4749 = vmatpush3.bf16.msra.mxu0 %v4748_v57  ;;  %v3879_v57 = vld [vmem:[%s6082_s6 + $0xc0] sm:$0xff]  ;;  %v4823_v22 = vpack.c.bf16 %v3898_v17, %v3896_v16  ;;  %v4008_v26 = vld [vmem:[%s6083_s8 + $0x38] sm:$0xff] }
 0x219   :  { %v5081_v50 = vunpack.i.h.bf16 %v5079_v48  ;;  %v5080_v51 = vunpack.i.l.bf16 %v5079_v48  ;;  %4750 = vmatprep.subr.bf16.mxu0 %v5121_v30  ;;  %v3881_v48 = vld [vmem:[%s6082_s6 + $0xd0] sm:$0xff]  ;;  %v4841_v43 = vpack.c.bf16 %v4008_v26, %v4007_v40 }
 0x21a   :  { %v5084_v52 = vpop.permute.xlu0 %5083 }
 0x21b   :  { %v4751_v18 = vpack.c.bf16 %v5081_v50, %v5080_v51  ;;  %v5086_v55 = vunpack.i.h.bf16 %v5084_v52  ;;  %v5085_v54 = vunpack.i.l.bf16 %v5084_v52  ;;  %4548 = vmatmul.mubr.msk.f32.vlgmr.msra.gmra.mrb[18].mxu0 %vm1007_vm8, %v5654_v19  ;;  %v3886_v50 = vld [vmem:[%s6082_s6 + $0xf8] sm:$0xff]  ;;  %v4809_v51 = vpack.c.bf16 %v3881_v48, %v3879_v57  ;;  %v4011_v57 = vld [vmem:[%s6083_s8 + $0x50] sm:$0xff] }
 0x21c   :  { %v5089_v9 = vpop.permute.xlu1 %5088  ;;  %4554 = vmatprep.mubr.msk.f32.mxu0 %vm5122_vm5, %v5669_v25  ;;  %4590 = vmatmul.mubr.msk.f32.vlgmr.msra.gmra.mrb[18].mxu1 %vm1007_vm8, %v5570_v27  ;;  %v4012_v48 = vld [vmem:[%s6083_s8 + $0x58] sm:$0xff] }
 0x21d   :  { %v5091_v56 = vunpack.i.h.bf16 %v5089_v9  ;;  %v5090_v59 = vunpack.i.l.bf16 %v5089_v9  ;;  %4752 = vmatpush3.bf16.msra.mxu0 %v4751_v18  ;;  %4770 = vmatpush3.bf16.msra.mxu1 %v5674_v28  ;;  %v3080_v61 = vsel %vm3079_vm2, %v5085_v54, %v5086_v55  ;;  %v3863_v28 = vld [vmem:[%s6082_s6 + $0x40] sm:$0xff]  ;;  %v3885_v54 = vld [vmem:[%s6082_s6 + $0xf0] sm:$0xff] }
 0x21e   :  { %4753 = vmatprep.subr.bf16.mxu0 %v5121_v30  ;;  %4596 = vmatprep.mubr.msk.f32.mxu1 %vm5122_vm5, %v5669_v25  ;;  %v3883_v55 = vld [vmem:[%s6082_s6 + $0xe0] sm:$0xff] }
 0x21f   :  { %v3081_v63 = vsel %vm3079_vm2, %v5090_v59, %v5091_v56  ;;  %4771 = vmatprep.subr.bf16.mxu1 %v5121_v30  ;;  %v3888_v59 = vld [vmem:[%s6082_s6 + $0x108] sm:$0xff] }
 0x220   :  { %v4754_v0 = vpack.c.bf16 %v3081_v63, %v3080_v61  ;;  %v3890_v61 = vld [vmem:[%s6082_s6 + $0x118] sm:$0xff]  ;;  %v4813_v63 = vpack.c.bf16 %v3885_v54, %v3883_v55 }
 0x221   :  { %v4016_v55 = vld [vmem:[%s6083_s8 + $0x78] sm:$0xff] }
 0x223   :  { %4555 = vmatmul.mubr.msk.f32.vlgmr.msra.gmra.mrb[18].mxu0 %vm1007_vm8, %v5679_v29 }
 0x224   :  { %4755 = vmatpush3.bf16.msra.mxu0 %v4754_v0  ;;  %4561 = vmatprep.mubr.msk.f32.mxu0 %vm5122_vm5, %v5669_v25 }
 0x225   :  { %4597 = vmatmul.mubr.msk.f32.vlgmr.msra.gmra.mrb[18].mxu1 %vm1007_vm8, %v5599_v45  ;;  %4784 = vmatprep.subr.bf16.mxu0 %v4783_v13 }
 0x226   :  { %4773 = vmatpush3.bf16.msra.mxu1 %v5741_v39  ;;  %4603 = vmatprep.mubr.msk.f32.mxu1 %vm5122_vm5, %v5669_v25  ;;  %v3871_v39 = vld [vmem:[%s6082_s6 + $0x80] sm:$0xff] }
 0x227   :  { %4774 = vmatprep.subr.bf16.mxu1 %v5121_v30  ;;  %v4801_v53 = vpack.c.bf16 %v3873_v41, %v3871_v39 }
 0x22b   :  { %4562 = vmatmul.mubr.msk.f32.vlgmr.msra.gmra.mrb[18].mxu0 %vm1007_vm8, %v5696_v31 }
 0x22d   :  { %4604 = vmatmul.mubr.msk.f32.vlgmr.msra.gmra.mrb[18].mxu1 %vm1007_vm8, %v5632_v10  ;;  %v3806_v11 = vpop.permute.xlu1 %3805 }
 0x22e   :  { %4776 = vmatpush3.bf16.msra.mxu1 %v4751_v18  ;;  %4610 = vmatprep.mubr.msk.f32.mxu1 %vm5122_vm5, %v5669_v25  ;;  %v4811_v18 = vpack.c.bf16 %v3886_v50, %v3884_v49  ;;  %v4847_v49 = vpack.c.bf16 %v4012_v48, %v4011_v57  ;;  %v4013_v50 = vld [vmem:[%s6083_s8 + $0x60] sm:$0xff] }
 0x22f   :  { %4777 = vmatprep.subr.bf16.mxu1 %v5121_v30 }
 0x235   :  { %4611 = vmatmul.mubr.msk.f32.vlgmr.msra.gmra.mrb[18].mxu1 %vm1007_vm8, %v5654_v19  ;;  %v4785_v19 = vpack.c.bf16 %v3857_v14, %v3855_v12 }
 0x236   :  { %4779 = vmatpush3.bf16.msra.mxu1 %v4754_v0  ;;  %4617 = vmatprep.mubr.msk.f32.mxu1 %vm5122_vm5, %v5669_v25  ;;  %v4815_v0 = vpack.c.bf16 %v3890_v61, %v3888_v59  ;;  %v4019_v61 = vld [vmem:[%s6083_s8 + $0x90] sm:$0xff] }
 0x237   :  { %4780 = vmatprep.subr.bf16.mxu1 %v5121_v30  ;;  %4786 = vmatpush1.bf16.msra.mxu0 %v4785_v19  ;;  %v3895_v19 = vld [vmem:[%s6082_s6 + $0x140] sm:$0xff] }
 0x238   :  { %4788 = vmatprep.subr.bf16.mxu0 %v4787_v20 }
 0x23b   :  { %4790 = vmatpush1.bf16.msra.mxu0 %v4789_v23  ;;  %v3902_v23 = vld [vmem:[%s6082_s6 + $0x178] sm:$0xff] }
 0x23d   :  { %4618 = vmatmul.mubr.msk.f32.vlgmr.msra.gmra.mrb[18].mxu1 %vm1007_vm8, %v5679_v29  ;;  %v3865_v29 = vld [vmem:[%s6082_s6 + $0x50] sm:$0xff] }
 0x23e   :  { %4624 = vmatprep.mubr.msk.f32.mxu1 %vm5122_vm5, %v5669_v25  ;;  %v3866_v25 = vld [vmem:[%s6082_s6 + $0x58] sm:$0xff]  ;;  %v4793_v58 = vpack.c.bf16 %v3865_v29, %v3863_v28  ;;  %v3901_v29 = vld [vmem:[%s6082_s6 + $0x170] sm:$0xff]  ;;  %vm3828_vm5 = vcmask 400384  }
 0x23f   :  { %v4791_v3 = vpack.c.bf16 %v3866_v25, %v3864_v24  ;;  %v4825_v24 = vpack.c.bf16 %v3897_v15, %v3895_v19  ;;  %v3900_v25 = vld [vmem:[%s6082_s6 + $0x168] sm:$0xff]  ;;  %v4021_v19 = vld [vmem:[%s6083_s8 + $0xa0] sm:$0xff]  ;;  %v4023_v15 = vld [vmem:[%s6083_s8 + $0xb0] sm:$0xff] }
 0x240   :  { %v4827_v28 = vpack.c.bf16 %v3902_v23, %v3900_v25  ;;  %v3907_v23 = vlaneseq }
 0x241   :  { %4792 = vmatprep.subr.bf16.mxu0 %v4791_v3  ;;  %v3899_v3 = vld [vmem:[%s6082_s6 + $0x160] sm:$0xff] }
 0x242   :  { %4794 = vmatpush1.bf16.msra.mxu0 %v4793_v58  ;;  %v3903_v58 = vld [vmem:[%s6082_s6 + $0x180] sm:$0xf] }
 0x272   :  { %v5094_v27 = vpop.permute.xlu0 %5093 }
 0x273   :  { %v5096_v45 = vunpack.i.h.bf16 %v5094_v27  ;;  %v5095_v1 = vunpack.i.l.bf16 %v5094_v27  ;;  %v3887_v27 = vld [vmem:[%s6082_s6 + $0x100] sm:$0xff] }
 0x275   :  { %v4781_v2 = vpack.c.bf16 %v5096_v45, %v5095_v1  ;;  %v3889_v45 = vld [vmem:[%s6082_s6 + $0x110] sm:$0xff]  ;;  %v3892_v1 = vld [vmem:[%s6082_s6 + $0x128] sm:$0xff] }
 0x277   :  { %4782 = vmatpush3.bf16.msra.mxu1 %v4781_v2  ;;  %v3894_v2 = vld [vmem:[%s6082_s6 + $0x138] sm:$0xff] }
 0x278   :  { %4831 = vmatprep.subr.bf16.mxu1 %v5121_v30 }
 0x27a   :  { %4625 = vmatmul.mubr.msk.f32.vlgmr.msra.gmra.mrb[18].mxu1 %vm1007_vm8, %v5696_v31  ;;  %v3868_v31 = vld [vmem:[%s6082_s6 + $0x68] sm:$0xff]  ;;  %vm3917_vm8 = vcmask 556032  }
 0x27b   :  { %v4795_v32 = vpack.c.bf16 %v3870_v21, %v3868_v31  ;;  %v4829_v31 = vpack.c.bf16 %v3901_v29, %v3899_v3  ;;  %v3904_v21 = vld [vmem:[%s6082_s6 + $0x188] sm:$0xf]  ;;  %4833 = vmatpush1.bf16.msra.mxu1 %v4832_v36  ;;  %v3908_v3 = vshrl.u32 %v3907_v23, 7  ;;  %v3905_v29 = vld [vmem:[%s6084_s7] sm:$0x3]  ;;  %s5141_s7 = smov 118  }
 0x27c   :  { %4834 = vmatprep.subr.bf16.mxu1 %v5121_v30 }
 0x27d   :  { %4796 = vmatprep.subr.bf16.mxu0 %v4795_v32 }
 0x27e   :  { %4798 = vmatpush1.bf16.msra.mxu0 %v4797_v37  ;;  %v4003_v37 = vld [vmem:[%s6083_s8 + $0x10] sm:$0xff] }
 0x27f   :  { %4800 = vmatprep.subr.bf16.mxu0 %v4799_v38  ;;  %v4004_v38 = vld [vmem:[%s6083_s8 + $0x18] sm:$0xff] }
 0x280   :  { %v4835_v42 = vpack.c.bf16 %v4004_v38, %v4003_v37 }
 0x282   :  { %4802 = vmatpush1.bf16.msra.mxu0 %v4801_v53  ;;  %v4006_v53 = vld [vmem:[%s6083_s8 + $0x28] sm:$0xff]  ;;  %4836 = vmatpush1.bf16.msra.mxu1 %v4835_v42 }
 0x283   :  { %4804 = vmatprep.subr.bf16.mxu0 %v4803_v8  ;;  %v4838_v8 = vpack.c.bf16 %v4006_v53, %v4005_v60  ;;  %4837 = vmatprep.subr.bf16.mxu1 %v5121_v30 }
 0x286   :  { %4806 = vmatpush1.bf16.msra.mxu0 %v4805_v46  ;;  %4839 = vmatpush1.bf16.msra.mxu1 %v4838_v8  ;;  %v4010_v46 = vld [vmem:[%s6083_s8 + $0x48] sm:$0xff] }
 0x287   :  { %4808 = vmatprep.subr.bf16.mxu0 %v4807_v47  ;;  %4840 = vmatprep.subr.bf16.mxu1 %v5121_v30  ;;  %v4844_v47 = vpack.c.bf16 %v4010_v46, %v4009_v44 }
 0x28a   :  { %4810 = vmatpush1.bf16.msra.mxu0 %v4809_v51  ;;  %4842 = vmatpush1.bf16.msra.mxu1 %v4841_v43  ;;  %v4014_v51 = vld [vmem:[%s6083_s8 + $0x68] sm:$0xff] }
 0x28b   :  { %4812 = vmatprep.subr.bf16.mxu0 %v4811_v18  ;;  %4843 = vmatprep.subr.bf16.mxu1 %v5121_v30  ;;  %v4015_v18 = vld [vmem:[%s6083_s8 + $0x70] sm:$0xff] }
 0x28c   :  { %v4853_v54 = vpack.c.bf16 %v4016_v55, %v4015_v18 }
 0x28e   :  { %4814 = vmatpush1.bf16.msra.mxu0 %v4813_v63  ;;  %4845 = vmatpush1.bf16.msra.mxu1 %v4844_v47  ;;  %v4020_v63 = vld [vmem:[%s6083_s8 + $0x98] sm:$0xff] }
 0x28f   :  { %4816 = vmatprep.subr.bf16.mxu0 %v4815_v0  ;;  %4846 = vmatprep.subr.bf16.mxu1 %v5121_v30  ;;  %v4859_v0 = vpack.c.bf16 %v4020_v63, %v4019_v61 }
 0x292   :  { %4848 = vmatpush1.bf16.msra.mxu1 %v4847_v49 }
 0x293   :  { %4849 = vmatprep.subr.bf16.mxu1 %v5121_v30 }
 0x296   :  { %v5815_v4 = vpop.f32.mrb[16].mxu0 }
 0x297   :  { %v4437_v5 = vpop.f32.mrb[17].mxu0 }
 0x298   :  { %v4819_v5 = vpack.c.bf16 %v3894_v2, %v3892_v1 }
 0x2d3   :  { %v5817_v62 = vpop.f32.mrb[16].mxu1 }
 0x2d4   :  { %v2475_v10 = vmax.f32 %v5815_v4, %v5817_v62  ;;  %v4500_v6 = vpop.f32.mrb[17].mxu1  ;;  %v4817_v4 = vpack.c.bf16 %v3889_v45, %v3887_v27  ;;  %v3891_v62 = vld [vmem:[%s6082_s6 + $0x120] sm:$0xff] }
 0x2d6   :  { %4818 = vmatpush1.bf16.msra.mxu0 %v4817_v4 }
 0x2d7   :  { %4820 = vmatprep.subr.bf16.mxu0 %v4819_v5 }
 0x2fe   :  { %v3150_v52 = vpop.f32.mrb[18].mxu0 }
 0x2ff   :  { %v3155_v9 = vmax.f32 %v2475_v10, %v3150_v52  ;;  %v4563_v56 = vpop.f32.mrb[19].mxu0  ;;  %v3893_v10 = vld [vmem:[%s6082_s6 + $0x130] sm:$0xff]  ;;  %v4850_v52 = vpack.c.bf16 %v4014_v51, %v4013_v50 }
 0x300   :  { %v4821_v6 = vpack.c.bf16 %v3893_v10, %v3891_v62  ;;  %v4018_v56 = vld [vmem:[%s6083_s8 + $0x88] sm:$0xff] }
 0x301   :  { %4851 = vmatpush1.bf16.msra.mxu1 %v4850_v52 }
 0x302   :  { %4822 = vmatpush1.bf16.msra.mxu0 %v4821_v6  ;;  %4852 = vmatprep.subr.bf16.mxu1 %v5121_v30 }
 0x303   :  { %4824 = vmatprep.subr.bf16.mxu0 %v4823_v22 }
 0x305   :  { %4854 = vmatpush1.bf16.msra.mxu1 %v4853_v54 }
 0x306   :  { %4826 = vmatpush1.bf16.msra.mxu0 %v4825_v24  ;;  %4855 = vmatprep.subr.bf16.mxu1 %v5121_v30  ;;  %v4024_v24 = vld [vmem:[%s6083_s8 + $0xb8] sm:$0xff] }
 0x307   :  { %4828 = vmatprep.subr.bf16.mxu0 %v4827_v28  ;;  %v4865_v25 = vpack.c.bf16 %v4024_v24, %v4023_v15  ;;  %v3909_v28 = vsub.s32 0, %v3908_v3 }
 0x30a   :  { %4830 = vmatpush1.bf16.msra.mxu0 %v4829_v31  ;;  %v3913_v31 = vsub.s32 1, %v3908_v3 }
 0x30b   :  { %4262 = vmatprep.subr.msk.mxu0 %vm3921_vm4, %v3904_v21  ;;  %v3910_v21 = vrot.slane %v3905_v29, %v3909_v28 }
 0x30e   :  { %4263 = vmatpush1.msk.msra.mxu0 %vm3921_vm4, %v3903_v58  ;;  %v3914_v58 = vrot.slane %v3905_v29, %v3913_v31 }
 0x34d   :  { %v3796_v7 = vpop.f32.mrb[18].mxu1 }
 0x34e   :  { %v3801_v12 = vmax.f32 %v3155_v9, %v3796_v7  ;;  %v4626_v13 = vpop.f32.mrb[19].mxu1  ;;  %v4017_v9 = vld [vmem:[%s6083_s8 + $0x80] sm:$0xff] }
 0x34f   :  { %v4856_v59 = vpack.c.bf16 %v4018_v56, %v4017_v9 }
 0x350   :  { %v3808_v14 = vadd.f32 %v3806_v11, %v3801_v12 }
 0x351   :  { %4857 = vmatpush1.bf16.msra.mxu1 %v4856_v59 }
 0x352   :  { %v3809_v20 = vmax.f32 %v3808_v14, 0.0  ;;  %4858 = vmatprep.subr.bf16.mxu1 %v5121_v30 }
 0x354   :  { %3811 = vst.msk [vmem:[#allocation3] sm:$0xf] %vm3810_vm3, %v3809_v20  ;;  %v4022_v20 = vld [vmem:[%s6083_s8 + $0xa8] sm:$0xff] }
 0x355   :  { %4860 = vmatpush1.bf16.msra.mxu1 %v4859_v0  ;;  %v4862_v22 = vpack.c.bf16 %v4022_v20, %v4021_v19 }
 0x356   :  { %4861 = vmatprep.subr.bf16.mxu1 %v5121_v30 }
 0x359   :  { %4863 = vmatpush1.bf16.msra.mxu1 %v4862_v22 }
 0x35a   :  { %4864 = vmatprep.subr.bf16.mxu1 %v5121_v30  ;;  %v4265_v30 = vld [vmem:[%s6085_s9] ss:$0 sm:$0xff] }
 0x35b   :  { %v3814_v32 = vld [vmem:[#allocation3 + $0x2] sm:$0x1]  ;;  %v5974_v33 = vld [vmem:[#allocation3] sm:$0x1]  ;;  %v3813_v39 = vld [vmem:[#allocation3 + $0x1] sm:$0x1] }
 0x35c   :  { %3838 = vrot.lane.b32.xlu1 %v3814_v32, %s5138_s4  ;;  %3835 = vrot.lane.b32.xlu0 %v5974_v33, %s5139_s19  ;;  %v3815_v41 = vld [vmem:[#allocation3 + $0x3] sm:$0x1] }
 0x35d   :  { %4866 = vmatpush1.bf16.msra.mxu1 %v4865_v25 }
 0x360   :  { %3817 = vrot.lane.b32.xlu1 %v3813_v39, %s5138_s4  ;;  %3841 = vrot.lane.b32.xlu0 %v3815_v41, %s5114_s15 }
 0x364   :  { %3825 = vrot.lane.b32.xlu1 %v3815_v41, %s5140_s27  ;;  %3821 = vrot.lane.b32.xlu0 %v3814_v32, %s5114_s15 }
 0x3ce   :  { %v3839_v27 = vpop.permute.xlu1 %3838  ;;  %v3836_v45 = vpop.permute.xlu0 %3835 }
 0x3cf   :  { %v3844_v1 = vsel %vm3828_vm5, %v3836_v45, %v3813_v39 }
 0x3d0   :  { %v3845_v5 = vsel %vm3830_vm6, %v3844_v1, %v3839_v27 }
 0x3d1   :  { %v3849_v10 = vrot.slane %v3845_v5, 7 }
 0x3d2   :  { %v3818_v2 = vpop.permute.xlu1 %3817  ;;  %v3842_v4 = vpop.permute.xlu0 %3841 }
 0x3d3   :  { %v3846_v62 = vsel %vm3832_vm7, %v3839_v27, %v3842_v4  ;;  %v3829_v6 = vsel %vm3828_vm5, %v5974_v33, %v3818_v2 }
 0x3d4   :  { %v3850_v7 = vrot.slane %v3846_v62, 7 }
 0x3d6   :  { %v3826_v11 = vpop.permute.xlu1 %3825  ;;  %v3822_v12 = vpop.permute.xlu0 %3821 }
 0x3d7   :  { %v3831_v13 = vsel %vm3830_vm6, %v3829_v6, %v3822_v12  ;;  %v3833_v14 = vsel %vm3832_vm7, %v3822_v12, %v3826_v11 }
 0x3d8   :  { %v3854_v16 = vsel %vm52_vm0, %v3833_v14, %v3850_v7  ;;  %v3853_v17 = vsel %vm52_vm0, %v3831_v13, %v3849_v10  ;;  %vm4032_vm0 = vcmask 523264  }
 0x3d9   :  { %4264 = vmatprep.mubr.msk.f32.mxu0 %vm3917_vm8, %v3854_v16 }
 0x3da   :  { %3993 = vmatmul.mubr.f32.vlgmr.msra.gmra.mrb[20].mxu0 %v3853_v17 }
 0x4ad   :  { %v3994_v32 = vpop.f32.mrb[20].mxu0 }
 0x4ae   :  { %v3995_v33 = vadd.f32 %v3994_v32, %v3910_v21  ;;  %v3996_v34 = vpop.f32.mrb[21].mxu0 }
 0x4af   :  { %v3997_v35 = vadd.f32 %v3996_v34, %v3914_v58 }
 0x4b0   :  { %v3999_v37 = vmax.f32 %v3995_v33, 0.0 }
 0x4b1   :  { %v4000_v36 = vmax.f32 %v3997_v35, 0.0 }
 0x4b3   :  { %4266 = vmatprep.mubr.msk.f32.mxu1 %vm4032_vm0, %v4000_v36 }
 0x4b4   :  { %4101 = vmatmul.mubr.f32.vlgmr.msra.gmra.mrb[20].mxu1 %v3999_v37 }
 0x587   :  { %v4102_v38 = vpop.f32.mrb[20].mxu1 }
 0x588   :  { %v4103_v39 = vadd.f32 %v4265_v30, %v4102_v38  ;;  %v4104_v41 = vpop.f32.mrb[21].mxu1 }
 0x58a   :  { %v4120_v42 = vsel %vm4119_vm9, %v4103_v39, -inf  ;;  %v4107_v60 = vsel %vm4106_vm10, %v4103_v39, -inf }
 0x58b   :  { %4121 = vmax.xlane.f32.xlu0 %v4120_v42  ;;  %4108 = vmax.xlane.f32.xlu1 %v4107_v60 }
 0x618   :  { %v4122_v53 = vpop.xlane.xlu0 %4121  ;;  %v4109_v8 = vpop.xlane.xlu1 %4108 }
 0x619   :  { %v4123_v40 = vsub.f32 %v4103_v39, %v4122_v53  ;;  %v4110_v26 = vsub.f32 %v4103_v39, %v4109_v8 }
 0x61b   :  { %v4124_v43 = vmul.f32 1.442695, %v4123_v40  ;;  %v4111_v44 = vmul.f32 1.442695, %v4110_v26 }
 0x61d   :  { %5098 = vpow2.f32 %v4124_v43 }
 0x61e   :  { %5100 = vpow2.f32 %v4111_v44 }
 0x627   :  { %v5099_v46 = vpop.eup %5098 }
 0x628   :  { %v5101_v47 = vpop.eup %5100  ;;  %4127 = vrot.lane.b32.xlu0 %v5099_v46, %s5141_s7 }
 0x629   :  { %v4113_v57 = vsel %vm4106_vm10, %v5101_v47, 0.0 }
 0x62a   :  { %4114 = vadd.xlane.f32.xlu1 %v4113_v57 }
 0x69a   :  { %v4128_v48 = vpop.permute.xlu0 %4127 }
 0x69b   :  { %v4131_v49 = vsel %vm4130_vm11, %v4128_v48, 0.0 }
 0x69c   :  { %4132 = vadd.xlane.f32.xlu1 %v4131_v49 }
 0x6b7   :  { %v4115_v50 = vpop.xlane.xlu1 %4114 }
 0x6b8   :  { %5102 = vlog2.f32 %v4115_v50 }
 0x6c2   :  { %v5103_v52 = vpop.eup %5102 }
 0x6c3   :  { %v4117_v18 = vmul.f32 0.6931472, %v5103_v52 }
 0x6c5   :  { %v4118_v9 = vsub.f32 %v4110_v26, %v4117_v18 }
 0x729   :  { %v4133_v51 = vpop.xlane.xlu1 %4132 }
 0x72a   :  { %5104 = vlog2.f32 %v4133_v51 }
 0x734   :  { %v5105_v55 = vpop.eup %5104 }
 0x735   :  { %v4135_v54 = vmul.f32 0.6931472, %v5105_v55 }
 0x737   :  { %v4136_v56 = vsub.f32 %v4123_v40, %v4135_v54 }
 0x739   :  { %v4138_v59 = vsel %vm4137_vm12, %v4118_v9, %v4136_v56 }
 0x73a   :  { %4140 = vst.msk [vmem:[%s6086_s10] sm:$0x3] %vm4139_vm13, %v4138_v59 }

</bundles_post_ra>
